<compile_context>
chip_gen: v5e
topology: v5e:2x2
jax: 0.10.0
libtpu: 0.0.40
codegen_flags: <defaults>
</compile_context>

<pallas_src>
import jax
import jax.numpy as jnp
from jax.experimental import pallas as pl
from jax.experimental.pallas import tpu as pltpu

_BN_EPS = 1e-5


def _round_up(x, m):
    return (x + m - 1) // m * m


# ----------------------------------------------------------------------------
# Fused kernel:  [BN affine -> (ReLU) -> conv]^w  + channel concat with input
# ----------------------------------------------------------------------------
def _make_convblock_kernel(n_layers, relu_flags, cout_list, taps_off,
                           D, G_al, L_out, T_in, C_in, C_pad, bblk):
    n_lanes = bblk * T_in

    def kernel(*refs):
        x_ref, mask_ref = refs[0], refs[1]
        params = refs[2:2 + 4 * n_layers]
        o_ref = refs[2 + 4 * n_layers]
        buf_ref = refs[3 + 4 * n_layers]       # (C_pad, bblk*T_in) activations
        stk_ref = refs[4 + 4 * n_layers]       # (kw*kw*C_pad, bblk*L_out)

        # Validity mask (1 on real pixels, 0 on conv padding / guard columns),
        # broadcast ONCE to buffer shape (hoisted out of the layer loop).
        mask_f = jnp.broadcast_to(mask_ref[...], (C_pad, n_lanes))

        # Stage the padded-flat raw input.  Only unused channel rows need
        # explicit zeroing (uninitialised VMEM could hold NaN; 0*NaN = NaN).
        if C_in < C_pad:
            buf_ref[C_in:C_pad, :] = jnp.zeros((C_pad - C_in, n_lanes),
                                               jnp.float32)
        for b in range(bblk):
            buf_ref[0:C_in, b * T_in:(b + 1) * T_in] = x_ref[b]

        for l in range(n_layers):
            scale_ref, shift_ref, w_ref, b_ref = params[4 * l:4 * l + 4]
            cout = cout_list[l]

            # BN (folded eval-mode affine) + optional ReLU, then zero the
            # padding positions so shift-and-stack matches Conv2d's zero
            # padding.  Written back to the ref so tap windows below are plain
            # vlds instead of lane-realigning slices of a live value.
            a = buf_ref[...] * scale_ref[...] + shift_ref[...]
            if relu_flags[l]:
                a = jnp.maximum(a, 0.0)
            buf_ref[...] = a * mask_f

            # Tap-stacked activation: contraction K = kw*kw*C_pad in ONE dot.
            for b in range(bblk):
                base = b * T_in + D
                for t, off in enumerate(taps_off):
                    stk_ref[t * C_pad:(t + 1) * C_pad,
                            b * L_out:(b + 1) * L_out] = \
                        buf_ref[:, base + off:base + off + L_out]

            y = jnp.dot(w_ref[...], stk_ref[...],
                        preferred_element_type=jnp.float32) + b_ref[...]

            if l < n_layers - 1:
                # Re-embed at padded-flat coords; G_al is 128-aligned, so these
                # are unmasked lane-aligned stores.
                for b in range(bblk):
                    buf_ref[0:cout,
                            b * T_in + G_al:b * T_in + G_al + L_out] = \
                        y[:, b * L_out:(b + 1) * L_out]
            else:
                for b in range(bblk):
                    o_ref[b, 0:cout, :] = \
                        y[:, b * L_out:(b + 1) * L_out].astype(o_ref.dtype)
                    # fused torch.cat([y, x], -3): raw input at valid coords
                    o_ref[b, cout:cout + C_in, :] = \
                        x_ref[b][:, G_al:G_al + L_out].astype(o_ref.dtype)

    return kernel


# ----------------------------------------------------------------------------
# Wrapper
# ----------------------------------------------------------------------------
def convblock_forward(x, params, kw=3, bblk=None):
    """ConvBlock forward.

    x: (B, C_in, H, W) float32 (NCHW).
    params: list of per-layer dicts with keys
        gamma, beta, mean, var : (c_in_l,)  BatchNorm2d (eval mode)
        weight                 : (c_out_l, c_in_l, kw, kw)
        bias                   : (c_out_l,)
        relu                   : bool
    Returns (B, c_out_last + C_in, H, W), matching ConvBlock.forward.
    """
    B, C_in, H, W = x.shape
    p = kw // 2
    Hp, Wp = H + 2 * p, W + 2 * p
    HpWp = Hp * Wp
    G = p * Wp + p                       # max |tap offset| in flat coords
    G_al = _round_up(G, 128)             # lane-aligned re-embed offset
    D = G_al - G                         # lead so re-embed lands on lane 128k
    L_out = _round_up(H * Wp, 128)       # lane-aligned output width per image
    T_in = L_out + 2 * G_al              # guarded per-image buffer width

    n_layers = len(params)
    cin_list = [int(lp['weight'].shape[1]) for lp in params]
    cout_list = [int(lp['weight'].shape[0]) for lp in params]
    relu_flags = [bool(lp['relu']) for lp in params]
    c_last = cout_list[-1]
    C_tot = c_last + C_in
    C_pad = _round_up(max([C_in] + cout_list), 8)   # sublane-aligned channels
    K = kw * kw * C_pad                             # stacked contraction dim

    # Batch blocking: several images per grid step, side-by-side on lanes.
    if bblk is None:
        bblk = min(B, 8)
    bblk = max(1, min(bblk, B))
    n_steps = -(-B // bblk)
    B_pad = n_steps * bblk

    # ---- glue: padded-flat NCHW input (B_pad, C_in, T_in); no transposes.
    xp = x
    if B_pad > B:
        xp = jnp.pad(xp, ((0, B_pad - B), (0, 0), (0, 0), (0, 0)))
    xp = jnp.pad(xp, ((0, 0), (0, 0), (p, p), (p, p))).reshape(B_pad, C_in, HpWp)
    xf = jnp.pad(xp, ((0, 0), (0, 0), (D, T_in - D - HpWp)))

    # ---- validity mask over guarded padded-flat coords (shared, resident).
    m = jnp.pad(jnp.ones((H, W), jnp.float32), ((p, p), (p, p))).reshape(HpWp)
    m = jnp.pad(m, (D, T_in - D - HpWp))
    mask = jnp.tile(m, (bblk,)).reshape(1, bblk * T_in)

    # ---- fold BN into scale/shift; tap-stacked, channel-padded conv weights.
    flat_params = []
    in_specs = [
        pl.BlockSpec((bblk, C_in, T_in), lambda g: (g, 0, 0)),   # x (batch blk)
        pl.BlockSpec((1, bblk * T_in), lambda g: (0, 0)),        # mask
    ]
    for lp, ci, co in zip(params, cin_list, cout_list):
        inv = (lp['gamma'] / jnp.sqrt(lp['var'] + _BN_EPS)).astype(jnp.float32)
        scale = jnp.zeros((C_pad, 1), jnp.float32).at[:ci, 0].set(inv)
        shift = jnp.zeros((C_pad, 1), jnp.float32).at[:ci, 0].set(
            (lp['beta'] - lp['mean'] * inv).astype(jnp.float32))
        # (co, ci, kh, kw) -> rows o, columns t*C_pad + c with t = dh*kw + dw
        wt = jnp.transpose(lp['weight'].astype(jnp.float32), (2, 3, 0, 1))
        wt = wt.reshape(kw * kw, co, ci)
        wt = jnp.pad(wt, ((0, 0), (0, 0), (0, C_pad - ci)))
        wt = jnp.transpose(wt, (1, 0, 2)).reshape(co, K)
        bias = lp['bias'].reshape(co, 1).astype(jnp.float32)
        flat_params += [scale, shift, wt, bias]
        in_specs += [
            pl.BlockSpec((C_pad, 1), lambda g: (0, 0)),
            pl.BlockSpec((C_pad, 1), lambda g: (0, 0)),
            pl.BlockSpec((co, K), lambda g: (0, 0)),
            pl.BlockSpec((co, 1), lambda g: (0, 0)),
        ]

    taps_off = [dh * Wp + dw for dh in range(kw) for dw in range(kw)]
    kernel = _make_convblock_kernel(n_layers, relu_flags, cout_list, taps_off,
                                    D, G_al, L_out, T_in, C_in, C_pad, bblk)

    y = pl.pallas_call(
        kernel,
        out_shape=jax.ShapeDtypeStruct((B_pad, C_tot, L_out), jnp.float32),
        grid=(n_steps,),
        in_specs=in_specs,
        out_specs=pl.BlockSpec((bblk, C_tot, L_out), lambda g: (g, 0, 0)),
        scratch_shapes=[pltpu.VMEM((C_pad, bblk * T_in), jnp.float32),
                        pltpu.VMEM((K, bblk * L_out), jnp.float32)],
        compiler_params=pltpu.CompilerParams(
            dimension_semantics=("parallel",)),
    )(xf, mask, *flat_params)

    # ---- glue: kernel column r = h*Wp + w  ->  NCHW (already channel-major).
    return y[:B, :, :H * Wp].reshape(B, C_tot, H, Wp)[:, :, :, :W]


# ----------------------------------------------------------------------------
# Pure-JAX reference (same semantics as the PyTorch module, eval-mode BN)
# ----------------------------------------------------------------------------
def convblock_reference(x, params, kw=3):
    p = kw // 2
    y = x
    for lp in params:
        inv = lp['gamma'] / jnp.sqrt(lp['var'] + _BN_EPS)
        a = (y * inv[None, :, None, None]
             + (lp['beta'] - lp['mean'] * inv)[None, :, None, None])
        if lp['relu']:
            a = jnp.maximum(a, 0.0)
        y = jax.lax.conv_general_dilated(
            a, lp['weight'], window_strides=(1, 1),
            padding=[(p, p), (p, p)],
            dimension_numbers=("NCHW", "OIHW", "NCHW"),
        ) + lp['bias'][None, :, None, None]
    return jnp.concatenate([y, x], axis=1)


if __name__ == "__main__":
    # ConvBlock(c_in=4, c=8, c_out=8, w=3, kw=3, last=False) at small shapes.
    # NB: the module applies BatchNorm2d(c_out) to a c-channel tensor in its
    #     final block, which is only well-defined when c == c_out.
    B, C_in, H, W = 2, 4, 16, 16
    c, c_out, kw = 8, 8, 3

    key = jax.random.PRNGKey(0)
    key, kx = jax.random.split(key)
    x = jax.random.normal(kx, (B, C_in, H, W), dtype=jnp.float32)

    # layers: (c_in->c), (c->c), (c->c_out), each BN+ReLU+Conv  (last=False)
    plan = [(C_in, c, True), (c, c, True), (c, c_out, True)]
    params = []
    for (ci, co, relu) in plan:
        key, k1, k2, k3, k4, k5, k6 = jax.random.split(key, 7)
        bound = 1.0 / ((ci * kw * kw) ** 0.5)
        params.append(dict(
            gamma=jax.random.uniform(k1, (ci,), minval=0.5, maxval=1.5,
                                     dtype=jnp.float32),
            beta=0.1 * jax.random.normal(k2, (ci,), dtype=jnp.float32),
            mean=0.1 * jax.random.normal(k3, (ci,), dtype=jnp.float32),
            var=jax.random.uniform(k4, (ci,), minval=0.5, maxval=1.5,
                                   dtype=jnp.float32),
            weight=jax.random.uniform(k5, (co, ci, kw, kw), minval=-bound,
                                      maxval=bound, dtype=jnp.float32),
            bias=jax.random.uniform(k6, (co,), minval=-bound, maxval=bound,
                                    dtype=jnp.float32),
            relu=relu,
        ))

    out = convblock_forward(x, params, kw=kw)
    out = jax.block_until_ready(out)

    ref = convblock_reference(x, params, kw=kw)
    ref = jax.block_until_ready(ref)

    assert out.shape == (B, c_out + C_in, H, W), out.shape
    max_err = float(jnp.max(jnp.abs(out - ref)))
    assert jnp.allclose(out, ref, atol=1e-4, rtol=1e-4), max_err
    print("KERNEL_OK")
</pallas_src>

<mosaic_0001>
module attributes {stable_mosaic.version = 11 : i64} {
  func.func @kernel(%arg0: i32, %arg1: memref<2x4x640xf32, #tpu.memory_space<vmem>>, %arg2: memref<1x1280xf32, #tpu.memory_space<vmem>>, %arg3: memref<8x1xf32, #tpu.memory_space<vmem>>, %arg4: memref<8x1xf32, #tpu.memory_space<vmem>>, %arg5: memref<8x72xf32, #tpu.memory_space<vmem>>, %arg6: memref<8x1xf32, #tpu.memory_space<vmem>>, %arg7: memref<8x1xf32, #tpu.memory_space<vmem>>, %arg8: memref<8x1xf32, #tpu.memory_space<vmem>>, %arg9: memref<8x72xf32, #tpu.memory_space<vmem>>, %arg10: memref<8x1xf32, #tpu.memory_space<vmem>>, %arg11: memref<8x1xf32, #tpu.memory_space<vmem>>, %arg12: memref<8x1xf32, #tpu.memory_space<vmem>>, %arg13: memref<8x72xf32, #tpu.memory_space<vmem>>, %arg14: memref<8x1xf32, #tpu.memory_space<vmem>>, %arg15: memref<2x12x384xf32, #tpu.memory_space<vmem>>, %arg16: memref<8x1280xf32, #tpu.memory_space<vmem>>, %arg17: memref<72x768xf32, #tpu.memory_space<vmem>>) attributes {dimension_semantics = [#tpu.dimension_semantics<parallel>], iteration_bounds = array<i64: 1>, scalar_prefetch = 0 : i64, scratch_operands = 2 : i64, tpu.core_type = #tpu.core_type<tc>, window_params = [{transform_indices = @transform_0, window_bounds = array<i64: 2, 4, 640>}, {pipeline_mode = #tpu.pipeline_mode<synchronous>, transform_indices = @transform_1, window_bounds = array<i64: 1, 1280>}, {pipeline_mode = #tpu.pipeline_mode<synchronous>, transform_indices = @transform_2, window_bounds = array<i64: 8, 1>}, {pipeline_mode = #tpu.pipeline_mode<synchronous>, transform_indices = @transform_3, window_bounds = array<i64: 8, 1>}, {pipeline_mode = #tpu.pipeline_mode<synchronous>, transform_indices = @transform_4, window_bounds = array<i64: 8, 72>}, {pipeline_mode = #tpu.pipeline_mode<synchronous>, transform_indices = @transform_5, window_bounds = array<i64: 8, 1>}, {pipeline_mode = #tpu.pipeline_mode<synchronous>, transform_indices = @transform_6, window_bounds = array<i64: 8, 1>}, {pipeline_mode = #tpu.pipeline_mode<synchronous>, transform_indices = @transform_7, window_bounds = array<i64: 8, 1>}, {pipeline_mode = #tpu.pipeline_mode<synchronous>, transform_indices = @transform_8, window_bounds = array<i64: 8, 72>}, {pipeline_mode = #tpu.pipeline_mode<synchronous>, transform_indices = @transform_9, window_bounds = array<i64: 8, 1>}, {pipeline_mode = #tpu.pipeline_mode<synchronous>, transform_indices = @transform_10, window_bounds = array<i64: 8, 1>}, {pipeline_mode = #tpu.pipeline_mode<synchronous>, transform_indices = @transform_11, window_bounds = array<i64: 8, 1>}, {pipeline_mode = #tpu.pipeline_mode<synchronous>, transform_indices = @transform_12, window_bounds = array<i64: 8, 72>}, {pipeline_mode = #tpu.pipeline_mode<synchronous>, transform_indices = @transform_13, window_bounds = array<i64: 8, 1>}, {transform_indices = @transform_14, window_bounds = array<i64: 2, 12, 384>}]} {
    %c0 = arith.constant 0 : index
    %c0_0 = arith.constant 0 : index
    %0 = vector.load %arg2[%c0, %c0_0] : memref<1x1280xf32, #tpu.memory_space<vmem>>, vector<1x1280xf32>
    %1 = vector.shape_cast %0 : vector<1x1280xf32> to vector<1x1280xf32>
    %2 = vector.broadcast %1 : vector<1x1280xf32> to vector<8x1280xf32>
    %cst = arith.constant 0.000000e+00 : f32
    %3 = vector.broadcast %cst : f32 to vector<4x1280xf32>
    %c4 = arith.constant 4 : index
    %c0_1 = arith.constant 0 : index
    %4 = vector.load %arg16[%c4, %c0_1] : memref<8x1280xf32, #tpu.memory_space<vmem>>, vector<4x1280xf32>
    tpu.vector_store %arg16[%c4, %c0_1], %3 {strides = array<i32>} : memref<8x1280xf32, #tpu.memory_space<vmem>>, vector<4x1280xf32>,
    %c0_2 = arith.constant 0 : index
    %c0_3 = arith.constant 0 : index
    %c0_4 = arith.constant 0 : index
    %5 = vector.load %arg1[%c0_2, %c0_3, %c0_4] : memref<2x4x640xf32, #tpu.memory_space<vmem>>, vector<1x4x640xf32>
    %6 = vector.shape_cast %5 : vector<1x4x640xf32> to vector<4x640xf32>
    %c0_5 = arith.constant 0 : index
    %c0_6 = arith.constant 0 : index
    %7 = vector.load %arg16[%c0_5, %c0_6] : memref<8x1280xf32, #tpu.memory_space<vmem>>, vector<4x640xf32>
    tpu.vector_store %arg16[%c0_5, %c0_6], %6 {strides = array<i32>} : memref<8x1280xf32, #tpu.memory_space<vmem>>, vector<4x640xf32>,
    %c1 = arith.constant 1 : index
    %c0_7 = arith.constant 0 : index
    %c0_8 = arith.constant 0 : index
    %8 = vector.load %arg1[%c1, %c0_7, %c0_8] : memref<2x4x640xf32, #tpu.memory_space<vmem>>, vector<1x4x640xf32>
    %9 = vector.shape_cast %8 : vector<1x4x640xf32> to vector<4x640xf32>
    %c0_9 = arith.constant 0 : index
    %c640 = arith.constant 640 : index
    %10 = vector.load %arg16[%c0_9, %c640] : memref<8x1280xf32, #tpu.memory_space<vmem>>, vector<4x640xf32>
    tpu.vector_store %arg16[%c0_9, %c640], %9 {strides = array<i32>} : memref<8x1280xf32, #tpu.memory_space<vmem>>, vector<4x640xf32>,
    %c0_10 = arith.constant 0 : index
    %c0_11 = arith.constant 0 : index
    %11 = vector.load %arg16[%c0_10, %c0_11] : memref<8x1280xf32, #tpu.memory_space<vmem>>, vector<8x1280xf32>
    %c0_12 = arith.constant 0 : index
    %c0_13 = arith.constant 0 : index
    %12 = vector.load %arg3[%c0_12, %c0_13] : memref<8x1xf32, #tpu.memory_space<vmem>>, vector<8x1xf32>
    %13 = vector.broadcast %12 : vector<8x1xf32> to vector<8x1280xf32>
    %14 = arith.mulf %11, %13 : vector<8x1280xf32>
    %c0_14 = arith.constant 0 : index
    %c0_15 = arith.constant 0 : index
    %15 = vector.load %arg4[%c0_14, %c0_15] : memref<8x1xf32, #tpu.memory_space<vmem>>, vector<8x1xf32>
    %16 = vector.broadcast %15 : vector<8x1xf32> to vector<8x1280xf32>
    %17 = arith.addf %14, %16 : vector<8x1280xf32>
    %cst_16 = arith.constant 0.000000e+00 : f32
    %18 = vector.broadcast %cst_16 : f32 to vector<8x1280xf32>
    %19 = arith.maximumf %17, %18 : vector<8x1280xf32>
    %20 = arith.mulf %19, %2 : vector<8x1280xf32>
    %c0_17 = arith.constant 0 : index
    %c0_18 = arith.constant 0 : index
    %21 = vector.load %arg16[%c0_17, %c0_18] : memref<8x1280xf32, #tpu.memory_space<vmem>>, vector<8x1280xf32>
    tpu.vector_store %arg16[%c0_17, %c0_18], %20 {strides = array<i32>} : memref<8x1280xf32, #tpu.memory_space<vmem>>, vector<8x1280xf32>,
    %c0_19 = arith.constant 0 : index
    %c109 = arith.constant 109 : index
    %22 = vector.load %arg16[%c0_19, %c109] : memref<8x1280xf32, #tpu.memory_space<vmem>>, vector<8x384xf32>
    %c0_20 = arith.constant 0 : index
    %c0_21 = arith.constant 0 : index
    %23 = vector.load %arg17[%c0_20, %c0_21] : memref<72x768xf32, #tpu.memory_space<vmem>>, vector<8x384xf32>
    tpu.vector_store %arg17[%c0_20, %c0_21], %22 {strides = array<i32>} : memref<72x768xf32, #tpu.memory_space<vmem>>, vector<8x384xf32>,
    %c0_22 = arith.constant 0 : index
    %c110 = arith.constant 110 : index
    %24 = vector.load %arg16[%c0_22, %c110] : memref<8x1280xf32, #tpu.memory_space<vmem>>, vector<8x384xf32>
    %c8 = arith.constant 8 : index
    %c0_23 = arith.constant 0 : index
    %25 = vector.load %arg17[%c8, %c0_23] : memref<72x768xf32, #tpu.memory_space<vmem>>, vector<8x384xf32>
    tpu.vector_store %arg17[%c8, %c0_23], %24 {strides = array<i32>} : memref<72x768xf32, #tpu.memory_space<vmem>>, vector<8x384xf32>,
    %c0_24 = arith.constant 0 : index
    %c111 = arith.constant 111 : index
    %26 = vector.load %arg16[%c0_24, %c111] : memref<8x1280xf32, #tpu.memory_space<vmem>>, vector<8x384xf32>
    %c16 = arith.constant 16 : index
    %c0_25 = arith.constant 0 : index
    %27 = vector.load %arg17[%c16, %c0_25] : memref<72x768xf32, #tpu.memory_space<vmem>>, vector<8x384xf32>
    tpu.vector_store %arg17[%c16, %c0_25], %26 {strides = array<i32>} : memref<72x768xf32, #tpu.memory_space<vmem>>, vector<8x384xf32>,
    %c0_26 = arith.constant 0 : index
    %c127 = arith.constant 127 : index
    %28 = vector.load %arg16[%c0_26, %c127] : memref<8x1280xf32, #tpu.memory_space<vmem>>, vector<8x384xf32>
    %c24 = arith.constant 24 : index
    %c0_27 = arith.constant 0 : index
    %29 = vector.load %arg17[%c24, %c0_27] : memref<72x768xf32, #tpu.memory_space<vmem>>, vector<8x384xf32>
    tpu.vector_store %arg17[%c24, %c0_27], %28 {strides = array<i32>} : memref<72x768xf32, #tpu.memory_space<vmem>>, vector<8x384xf32>,
    %c0_28 = arith.constant 0 : index
    %c128 = arith.constant 128 : index
    %30 = vector.load %arg16[%c0_28, %c128] : memref<8x1280xf32, #tpu.memory_space<vmem>>, vector<8x384xf32>
    %c32 = arith.constant 32 : index
    %c0_29 = arith.constant 0 : index
    %31 = vector.load %arg17[%c32, %c0_29] : memref<72x768xf32, #tpu.memory_space<vmem>>, vector<8x384xf32>
    tpu.vector_store %arg17[%c32, %c0_29], %30 {strides = array<i32>} : memref<72x768xf32, #tpu.memory_space<vmem>>, vector<8x384xf32>,
    %c0_30 = arith.constant 0 : index
    %c129 = arith.constant 129 : index
    %32 = vector.load %arg16[%c0_30, %c129] : memref<8x1280xf32, #tpu.memory_space<vmem>>, vector<8x384xf32>
    %c40 = arith.constant 40 : index
    %c0_31 = arith.constant 0 : index
    %33 = vector.load %arg17[%c40, %c0_31] : memref<72x768xf32, #tpu.memory_space<vmem>>, vector<8x384xf32>
    tpu.vector_store %arg17[%c40, %c0_31], %32 {strides = array<i32>} : memref<72x768xf32, #tpu.memory_space<vmem>>, vector<8x384xf32>,
    %c0_32 = arith.constant 0 : index
    %c145 = arith.constant 145 : index
    %34 = vector.load %arg16[%c0_32, %c145] : memref<8x1280xf32, #tpu.memory_space<vmem>>, vector<8x384xf32>
    %c48 = arith.constant 48 : index
    %c0_33 = arith.constant 0 : index
    %35 = vector.load %arg17[%c48, %c0_33] : memref<72x768xf32, #tpu.memory_space<vmem>>, vector<8x384xf32>
    tpu.vector_store %arg17[%c48, %c0_33], %34 {strides = array<i32>} : memref<72x768xf32, #tpu.memory_space<vmem>>, vector<8x384xf32>,
    %c0_34 = arith.constant 0 : index
    %c146 = arith.constant 146 : index
    %36 = vector.load %arg16[%c0_34, %c146] : memref<8x1280xf32, #tpu.memory_space<vmem>>, vector<8x384xf32>
    %c56 = arith.constant 56 : index
    %c0_35 = arith.constant 0 : index
    %37 = vector.load %arg17[%c56, %c0_35] : memref<72x768xf32, #tpu.memory_space<vmem>>, vector<8x384xf32>
    tpu.vector_store %arg17[%c56, %c0_35], %36 {strides = array<i32>} : memref<72x768xf32, #tpu.memory_space<vmem>>, vector<8x384xf32>,
    %c0_36 = arith.constant 0 : index
    %c147 = arith.constant 147 : index
    %38 = vector.load %arg16[%c0_36, %c147] : memref<8x1280xf32, #tpu.memory_space<vmem>>, vector<8x384xf32>
    %c64 = arith.constant 64 : index
    %c0_37 = arith.constant 0 : index
    %39 = vector.load %arg17[%c64, %c0_37] : memref<72x768xf32, #tpu.memory_space<vmem>>, vector<8x384xf32>
    tpu.vector_store %arg17[%c64, %c0_37], %38 {strides = array<i32>} : memref<72x768xf32, #tpu.memory_space<vmem>>, vector<8x384xf32>,
    %c0_38 = arith.constant 0 : index
    %c749 = arith.constant 749 : index
    %40 = vector.load %arg16[%c0_38, %c749] : memref<8x1280xf32, #tpu.memory_space<vmem>>, vector<8x384xf32>
    %c0_39 = arith.constant 0 : index
    %c384 = arith.constant 384 : index
    %41 = vector.load %arg17[%c0_39, %c384] : memref<72x768xf32, #tpu.memory_space<vmem>>, vector<8x384xf32>
    tpu.vector_store %arg17[%c0_39, %c384], %40 {strides = array<i32>} : memref<72x768xf32, #tpu.memory_space<vmem>>, vector<8x384xf32>,
    %c0_40 = arith.constant 0 : index
    %c750 = arith.constant 750 : index
    %42 = vector.load %arg16[%c0_40, %c750] : memref<8x1280xf32, #tpu.memory_space<vmem>>, vector<8x384xf32>
    %c8_41 = arith.constant 8 : index
    %c384_42 = arith.constant 384 : index
    %43 = vector.load %arg17[%c8_41, %c384_42] : memref<72x768xf32, #tpu.memory_space<vmem>>, vector<8x384xf32>
    tpu.vector_store %arg17[%c8_41, %c384_42], %42 {strides = array<i32>} : memref<72x768xf32, #tpu.memory_space<vmem>>, vector<8x384xf32>,
    %c0_43 = arith.constant 0 : index
    %c751 = arith.constant 751 : index
    %44 = vector.load %arg16[%c0_43, %c751] : memref<8x1280xf32, #tpu.memory_space<vmem>>, vector<8x384xf32>
    %c16_44 = arith.constant 16 : index
    %c384_45 = arith.constant 384 : index
    %45 = vector.load %arg17[%c16_44, %c384_45] : memref<72x768xf32, #tpu.memory_space<vmem>>, vector<8x384xf32>
    tpu.vector_store %arg17[%c16_44, %c384_45], %44 {strides = array<i32>} : memref<72x768xf32, #tpu.memory_space<vmem>>, vector<8x384xf32>,
    %c0_46 = arith.constant 0 : index
    %c767 = arith.constant 767 : index
    %46 = vector.load %arg16[%c0_46, %c767] : memref<8x1280xf32, #tpu.memory_space<vmem>>, vector<8x384xf32>
    %c24_47 = arith.constant 24 : index
    %c384_48 = arith.constant 384 : index
    %47 = vector.load %arg17[%c24_47, %c384_48] : memref<72x768xf32, #tpu.memory_space<vmem>>, vector<8x384xf32>
    tpu.vector_store %arg17[%c24_47, %c384_48], %46 {strides = array<i32>} : memref<72x768xf32, #tpu.memory_space<vmem>>, vector<8x384xf32>,
    %c0_49 = arith.constant 0 : index
    %c768 = arith.constant 768 : index
    %48 = vector.load %arg16[%c0_49, %c768] : memref<8x1280xf32, #tpu.memory_space<vmem>>, vector<8x384xf32>
    %c32_50 = arith.constant 32 : index
    %c384_51 = arith.constant 384 : index
    %49 = vector.load %arg17[%c32_50, %c384_51] : memref<72x768xf32, #tpu.memory_space<vmem>>, vector<8x384xf32>
    tpu.vector_store %arg17[%c32_50, %c384_51], %48 {strides = array<i32>} : memref<72x768xf32, #tpu.memory_space<vmem>>, vector<8x384xf32>,
    %c0_52 = arith.constant 0 : index
    %c769 = arith.constant 769 : index
    %50 = vector.load %arg16[%c0_52, %c769] : memref<8x1280xf32, #tpu.memory_space<vmem>>, vector<8x384xf32>
    %c40_53 = arith.constant 40 : index
    %c384_54 = arith.constant 384 : index
    %51 = vector.load %arg17[%c40_53, %c384_54] : memref<72x768xf32, #tpu.memory_space<vmem>>, vector<8x384xf32>
    tpu.vector_store %arg17[%c40_53, %c384_54], %50 {strides = array<i32>} : memref<72x768xf32, #tpu.memory_space<vmem>>, vector<8x384xf32>,
    %c0_55 = arith.constant 0 : index
    %c785 = arith.constant 785 : index
    %52 = vector.load %arg16[%c0_55, %c785] : memref<8x1280xf32, #tpu.memory_space<vmem>>, vector<8x384xf32>
    %c48_56 = arith.constant 48 : index
    %c384_57 = arith.constant 384 : index
    %53 = vector.load %arg17[%c48_56, %c384_57] : memref<72x768xf32, #tpu.memory_space<vmem>>, vector<8x384xf32>
    tpu.vector_store %arg17[%c48_56, %c384_57], %52 {strides = array<i32>} : memref<72x768xf32, #tpu.memory_space<vmem>>, vector<8x384xf32>,
    %c0_58 = arith.constant 0 : index
    %c786 = arith.constant 786 : index
    %54 = vector.load %arg16[%c0_58, %c786] : memref<8x1280xf32, #tpu.memory_space<vmem>>, vector<8x384xf32>
    %c56_59 = arith.constant 56 : index
    %c384_60 = arith.constant 384 : index
    %55 = vector.load %arg17[%c56_59, %c384_60] : memref<72x768xf32, #tpu.memory_space<vmem>>, vector<8x384xf32>
    tpu.vector_store %arg17[%c56_59, %c384_60], %54 {strides = array<i32>} : memref<72x768xf32, #tpu.memory_space<vmem>>, vector<8x384xf32>,
    %c0_61 = arith.constant 0 : index
    %c787 = arith.constant 787 : index
    %56 = vector.load %arg16[%c0_61, %c787] : memref<8x1280xf32, #tpu.memory_space<vmem>>, vector<8x384xf32>
    %c64_62 = arith.constant 64 : index
    %c384_63 = arith.constant 384 : index
    %57 = vector.load %arg17[%c64_62, %c384_63] : memref<72x768xf32, #tpu.memory_space<vmem>>, vector<8x384xf32>
    tpu.vector_store %arg17[%c64_62, %c384_63], %56 {strides = array<i32>} : memref<72x768xf32, #tpu.memory_space<vmem>>, vector<8x384xf32>,
    %c0_64 = arith.constant 0 : index
    %c0_65 = arith.constant 0 : index
    %58 = vector.load %arg5[%c0_64, %c0_65] : memref<8x72xf32, #tpu.memory_space<vmem>>, vector<8x72xf32>
    %c0_66 = arith.constant 0 : index
    %c0_67 = arith.constant 0 : index
    %59 = vector.load %arg17[%c0_66, %c0_67] : memref<72x768xf32, #tpu.memory_space<vmem>>, vector<72x768xf32>
    %cst_68 = arith.constant dense<0.000000e+00> : vector<8x768xf32>
    %60 = tpu.matmul %58, %59, %cst_68 {dimension_numbers = #tpu.dot_dimension_numbers<[1], [0], [0], [1], [0, 0, 1, 1], [], []>} : vector<8x72xf32>, vector<72x768xf32>, vector<8x768xf32> -> vector<8x768xf32>
    %c0_69 = arith.constant 0 : index
    %c0_70 = arith.constant 0 : index
    %61 = vector.load %arg6[%c0_69, %c0_70] : memref<8x1xf32, #tpu.memory_space<vmem>>, vector<8x1xf32>
    %62 = vector.broadcast %61 : vector<8x1xf32> to vector<8x768xf32>
    %63 = arith.addf %60, %62 : vector<8x768xf32>
    %64 = vector.extract_strided_slice %63 {offsets = [0, 0], sizes = [8, 384], strides = [1, 1]} : vector<8x768xf32> to vector<8x384xf32>
    %c0_71 = arith.constant 0 : index
    %c128_72 = arith.constant 128 : index
    %65 = vector.load %arg16[%c0_71, %c128_72] : memref<8x1280xf32, #tpu.memory_space<vmem>>, vector<8x384xf32>
    tpu.vector_store %arg16[%c0_71, %c128_72], %64 {strides = array<i32>} : memref<8x1280xf32, #tpu.memory_space<vmem>>, vector<8x384xf32>,
    %66 = vector.extract_strided_slice %63 {offsets = [0, 384], sizes = [8, 384], strides = [1, 1]} : vector<8x768xf32> to vector<8x384xf32>
    %c0_73 = arith.constant 0 : index
    %c768_74 = arith.constant 768 : index
    %67 = vector.load %arg16[%c0_73, %c768_74] : memref<8x1280xf32, #tpu.memory_space<vmem>>, vector<8x384xf32>
    tpu.vector_store %arg16[%c0_73, %c768_74], %66 {strides = array<i32>} : memref<8x1280xf32, #tpu.memory_space<vmem>>, vector<8x384xf32>,
    %c0_75 = arith.constant 0 : index
    %c0_76 = arith.constant 0 : index
    %68 = vector.load %arg16[%c0_75, %c0_76] : memref<8x1280xf32, #tpu.memory_space<vmem>>, vector<8x1280xf32>
    %c0_77 = arith.constant 0 : index
    %c0_78 = arith.constant 0 : index
    %69 = vector.load %arg7[%c0_77, %c0_78] : memref<8x1xf32, #tpu.memory_space<vmem>>, vector<8x1xf32>
    %70 = vector.broadcast %69 : vector<8x1xf32> to vector<8x1280xf32>
    %71 = arith.mulf %68, %70 : vector<8x1280xf32>
    %c0_79 = arith.constant 0 : index
    %c0_80 = arith.constant 0 : index
    %72 = vector.load %arg8[%c0_79, %c0_80] : memref<8x1xf32, #tpu.memory_space<vmem>>, vector<8x1xf32>
    %73 = vector.broadcast %72 : vector<8x1xf32> to vector<8x1280xf32>
    %74 = arith.addf %71, %73 : vector<8x1280xf32>
    %cst_81 = arith.constant 0.000000e+00 : f32
    %75 = vector.broadcast %cst_81 : f32 to vector<8x1280xf32>
    %76 = arith.maximumf %74, %75 : vector<8x1280xf32>
    %77 = arith.mulf %76, %2 : vector<8x1280xf32>
    %c0_82 = arith.constant 0 : index
    %c0_83 = arith.constant 0 : index
    %78 = vector.load %arg16[%c0_82, %c0_83] : memref<8x1280xf32, #tpu.memory_space<vmem>>, vector<8x1280xf32>
    tpu.vector_store %arg16[%c0_82, %c0_83], %77 {strides = array<i32>} : memref<8x1280xf32, #tpu.memory_space<vmem>>, vector<8x1280xf32>,
    %c0_84 = arith.constant 0 : index
    %c109_85 = arith.constant 109 : index
    %79 = vector.load %arg16[%c0_84, %c109_85] : memref<8x1280xf32, #tpu.memory_space<vmem>>, vector<8x384xf32>
    %c0_86 = arith.constant 0 : index
    %c0_87 = arith.constant 0 : index
    %80 = vector.load %arg17[%c0_86, %c0_87] : memref<72x768xf32, #tpu.memory_space<vmem>>, vector<8x384xf32>
    tpu.vector_store %arg17[%c0_86, %c0_87], %79 {strides = array<i32>} : memref<72x768xf32, #tpu.memory_space<vmem>>, vector<8x384xf32>,
    %c0_88 = arith.constant 0 : index
    %c110_89 = arith.constant 110 : index
    %81 = vector.load %arg16[%c0_88, %c110_89] : memref<8x1280xf32, #tpu.memory_space<vmem>>, vector<8x384xf32>
    %c8_90 = arith.constant 8 : index
    %c0_91 = arith.constant 0 : index
    %82 = vector.load %arg17[%c8_90, %c0_91] : memref<72x768xf32, #tpu.memory_space<vmem>>, vector<8x384xf32>
    tpu.vector_store %arg17[%c8_90, %c0_91], %81 {strides = array<i32>} : memref<72x768xf32, #tpu.memory_space<vmem>>, vector<8x384xf32>,
    %c0_92 = arith.constant 0 : index
    %c111_93 = arith.constant 111 : index
    %83 = vector.load %arg16[%c0_92, %c111_93] : memref<8x1280xf32, #tpu.memory_space<vmem>>, vector<8x384xf32>
    %c16_94 = arith.constant 16 : index
    %c0_95 = arith.constant 0 : index
    %84 = vector.load %arg17[%c16_94, %c0_95] : memref<72x768xf32, #tpu.memory_space<vmem>>, vector<8x384xf32>
    tpu.vector_store %arg17[%c16_94, %c0_95], %83 {strides = array<i32>} : memref<72x768xf32, #tpu.memory_space<vmem>>, vector<8x384xf32>,
    %c0_96 = arith.constant 0 : index
    %c127_97 = arith.constant 127 : index
    %85 = vector.load %arg16[%c0_96, %c127_97] : memref<8x1280xf32, #tpu.memory_space<vmem>>, vector<8x384xf32>
    %c24_98 = arith.constant 24 : index
    %c0_99 = arith.constant 0 : index
    %86 = vector.load %arg17[%c24_98, %c0_99] : memref<72x768xf32, #tpu.memory_space<vmem>>, vector<8x384xf32>
    tpu.vector_store %arg17[%c24_98, %c0_99], %85 {strides = array<i32>} : memref<72x768xf32, #tpu.memory_space<vmem>>, vector<8x384xf32>,
    %c0_100 = arith.constant 0 : index
    %c128_101 = arith.constant 128 : index
    %87 = vector.load %arg16[%c0_100, %c128_101] : memref<8x1280xf32, #tpu.memory_space<vmem>>, vector<8x384xf32>
    %c32_102 = arith.constant 32 : index
    %c0_103 = arith.constant 0 : index
    %88 = vector.load %arg17[%c32_102, %c0_103] : memref<72x768xf32, #tpu.memory_space<vmem>>, vector<8x384xf32>
    tpu.vector_store %arg17[%c32_102, %c0_103], %87 {strides = array<i32>} : memref<72x768xf32, #tpu.memory_space<vmem>>, vector<8x384xf32>,
    %c0_104 = arith.constant 0 : index
    %c129_105 = arith.constant 129 : index
    %89 = vector.load %arg16[%c0_104, %c129_105] : memref<8x1280xf32, #tpu.memory_space<vmem>>, vector<8x384xf32>
    %c40_106 = arith.constant 40 : index
    %c0_107 = arith.constant 0 : index
    %90 = vector.load %arg17[%c40_106, %c0_107] : memref<72x768xf32, #tpu.memory_space<vmem>>, vector<8x384xf32>
    tpu.vector_store %arg17[%c40_106, %c0_107], %89 {strides = array<i32>} : memref<72x768xf32, #tpu.memory_space<vmem>>, vector<8x384xf32>,
    %c0_108 = arith.constant 0 : index
    %c145_109 = arith.constant 145 : index
    %91 = vector.load %arg16[%c0_108, %c145_109] : memref<8x1280xf32, #tpu.memory_space<vmem>>, vector<8x384xf32>
    %c48_110 = arith.constant 48 : index
    %c0_111 = arith.constant 0 : index
    %92 = vector.load %arg17[%c48_110, %c0_111] : memref<72x768xf32, #tpu.memory_space<vmem>>, vector<8x384xf32>
    tpu.vector_store %arg17[%c48_110, %c0_111], %91 {strides = array<i32>} : memref<72x768xf32, #tpu.memory_space<vmem>>, vector<8x384xf32>,
    %c0_112 = arith.constant 0 : index
    %c146_113 = arith.constant 146 : index
    %93 = vector.load %arg16[%c0_112, %c146_113] : memref<8x1280xf32, #tpu.memory_space<vmem>>, vector<8x384xf32>
    %c56_114 = arith.constant 56 : index
    %c0_115 = arith.constant 0 : index
    %94 = vector.load %arg17[%c56_114, %c0_115] : memref<72x768xf32, #tpu.memory_space<vmem>>, vector<8x384xf32>
    tpu.vector_store %arg17[%c56_114, %c0_115], %93 {strides = array<i32>} : memref<72x768xf32, #tpu.memory_space<vmem>>, vector<8x384xf32>,
    %c0_116 = arith.constant 0 : index
    %c147_117 = arith.constant 147 : index
    %95 = vector.load %arg16[%c0_116, %c147_117] : memref<8x1280xf32, #tpu.memory_space<vmem>>, vector<8x384xf32>
    %c64_118 = arith.constant 64 : index
    %c0_119 = arith.constant 0 : index
    %96 = vector.load %arg17[%c64_118, %c0_119] : memref<72x768xf32, #tpu.memory_space<vmem>>, vector<8x384xf32>
    tpu.vector_store %arg17[%c64_118, %c0_119], %95 {strides = array<i32>} : memref<72x768xf32, #tpu.memory_space<vmem>>, vector<8x384xf32>,
    %c0_120 = arith.constant 0 : index
    %c749_121 = arith.constant 749 : index
    %97 = vector.load %arg16[%c0_120, %c749_121] : memref<8x1280xf32, #tpu.memory_space<vmem>>, vector<8x384xf32>
    %c0_122 = arith.constant 0 : index
    %c384_123 = arith.constant 384 : index
    %98 = vector.load %arg17[%c0_122, %c384_123] : memref<72x768xf32, #tpu.memory_space<vmem>>, vector<8x384xf32>
    tpu.vector_store %arg17[%c0_122, %c384_123], %97 {strides = array<i32>} : memref<72x768xf32, #tpu.memory_space<vmem>>, vector<8x384xf32>,
    %c0_124 = arith.constant 0 : index
    %c750_125 = arith.constant 750 : index
    %99 = vector.load %arg16[%c0_124, %c750_125] : memref<8x1280xf32, #tpu.memory_space<vmem>>, vector<8x384xf32>
    %c8_126 = arith.constant 8 : index
    %c384_127 = arith.constant 384 : index
    %100 = vector.load %arg17[%c8_126, %c384_127] : memref<72x768xf32, #tpu.memory_space<vmem>>, vector<8x384xf32>
    tpu.vector_store %arg17[%c8_126, %c384_127], %99 {strides = array<i32>} : memref<72x768xf32, #tpu.memory_space<vmem>>, vector<8x384xf32>,
    %c0_128 = arith.constant 0 : index
    %c751_129 = arith.constant 751 : index
    %101 = vector.load %arg16[%c0_128, %c751_129] : memref<8x1280xf32, #tpu.memory_space<vmem>>, vector<8x384xf32>
    %c16_130 = arith.constant 16 : index
    %c384_131 = arith.constant 384 : index
    %102 = vector.load %arg17[%c16_130, %c384_131] : memref<72x768xf32, #tpu.memory_space<vmem>>, vector<8x384xf32>
    tpu.vector_store %arg17[%c16_130, %c384_131], %101 {strides = array<i32>} : memref<72x768xf32, #tpu.memory_space<vmem>>, vector<8x384xf32>,
    %c0_132 = arith.constant 0 : index
    %c767_133 = arith.constant 767 : index
    %103 = vector.load %arg16[%c0_132, %c767_133] : memref<8x1280xf32, #tpu.memory_space<vmem>>, vector<8x384xf32>
    %c24_134 = arith.constant 24 : index
    %c384_135 = arith.constant 384 : index
    %104 = vector.load %arg17[%c24_134, %c384_135] : memref<72x768xf32, #tpu.memory_space<vmem>>, vector<8x384xf32>
    tpu.vector_store %arg17[%c24_134, %c384_135], %103 {strides = array<i32>} : memref<72x768xf32, #tpu.memory_space<vmem>>, vector<8x384xf32>,
    %c0_136 = arith.constant 0 : index
    %c768_137 = arith.constant 768 : index
    %105 = vector.load %arg16[%c0_136, %c768_137] : memref<8x1280xf32, #tpu.memory_space<vmem>>, vector<8x384xf32>
    %c32_138 = arith.constant 32 : index
    %c384_139 = arith.constant 384 : index
    %106 = vector.load %arg17[%c32_138, %c384_139] : memref<72x768xf32, #tpu.memory_space<vmem>>, vector<8x384xf32>
    tpu.vector_store %arg17[%c32_138, %c384_139], %105 {strides = array<i32>} : memref<72x768xf32, #tpu.memory_space<vmem>>, vector<8x384xf32>,
    %c0_140 = arith.constant 0 : index
    %c769_141 = arith.constant 769 : index
    %107 = vector.load %arg16[%c0_140, %c769_141] : memref<8x1280xf32, #tpu.memory_space<vmem>>, vector<8x384xf32>
    %c40_142 = arith.constant 40 : index
    %c384_143 = arith.constant 384 : index
    %108 = vector.load %arg17[%c40_142, %c384_143] : memref<72x768xf32, #tpu.memory_space<vmem>>, vector<8x384xf32>
    tpu.vector_store %arg17[%c40_142, %c384_143], %107 {strides = array<i32>} : memref<72x768xf32, #tpu.memory_space<vmem>>, vector<8x384xf32>,
    %c0_144 = arith.constant 0 : index
    %c785_145 = arith.constant 785 : index
    %109 = vector.load %arg16[%c0_144, %c785_145] : memref<8x1280xf32, #tpu.memory_space<vmem>>, vector<8x384xf32>
    %c48_146 = arith.constant 48 : index
    %c384_147 = arith.constant 384 : index
    %110 = vector.load %arg17[%c48_146, %c384_147] : memref<72x768xf32, #tpu.memory_space<vmem>>, vector<8x384xf32>
    tpu.vector_store %arg17[%c48_146, %c384_147], %109 {strides = array<i32>} : memref<72x768xf32, #tpu.memory_space<vmem>>, vector<8x384xf32>,
    %c0_148 = arith.constant 0 : index
    %c786_149 = arith.constant 786 : index
    %111 = vector.load %arg16[%c0_148, %c786_149] : memref<8x1280xf32, #tpu.memory_space<vmem>>, vector<8x384xf32>
    %c56_150 = arith.constant 56 : index
    %c384_151 = arith.constant 384 : index
    %112 = vector.load %arg17[%c56_150, %c384_151] : memref<72x768xf32, #tpu.memory_space<vmem>>, vector<8x384xf32>
    tpu.vector_store %arg17[%c56_150, %c384_151], %111 {strides = array<i32>} : memref<72x768xf32, #tpu.memory_space<vmem>>, vector<8x384xf32>,
    %c0_152 = arith.constant 0 : index
    %c787_153 = arith.constant 787 : index
    %113 = vector.load %arg16[%c0_152, %c787_153] : memref<8x1280xf32, #tpu.memory_space<vmem>>, vector<8x384xf32>
    %c64_154 = arith.constant 64 : index
    %c384_155 = arith.constant 384 : index
    %114 = vector.load %arg17[%c64_154, %c384_155] : memref<72x768xf32, #tpu.memory_space<vmem>>, vector<8x384xf32>
    tpu.vector_store %arg17[%c64_154, %c384_155], %113 {strides = array<i32>} : memref<72x768xf32, #tpu.memory_space<vmem>>, vector<8x384xf32>,
    %c0_156 = arith.constant 0 : index
    %c0_157 = arith.constant 0 : index
    %115 = vector.load %arg9[%c0_156, %c0_157] : memref<8x72xf32, #tpu.memory_space<vmem>>, vector<8x72xf32>
    %c0_158 = arith.constant 0 : index
    %c0_159 = arith.constant 0 : index
    %116 = vector.load %arg17[%c0_158, %c0_159] : memref<72x768xf32, #tpu.memory_space<vmem>>, vector<72x768xf32>
    %cst_160 = arith.constant dense<0.000000e+00> : vector<8x768xf32>
    %117 = tpu.matmul %115, %116, %cst_160 {dimension_numbers = #tpu.dot_dimension_numbers<[1], [0], [0], [1], [0, 0, 1, 1], [], []>} : vector<8x72xf32>, vector<72x768xf32>, vector<8x768xf32> -> vector<8x768xf32>
    %c0_161 = arith.constant 0 : index
    %c0_162 = arith.constant 0 : index
    %118 = vector.load %arg10[%c0_161, %c0_162] : memref<8x1xf32, #tpu.memory_space<vmem>>, vector<8x1xf32>
    %119 = vector.broadcast %118 : vector<8x1xf32> to vector<8x768xf32>
    %120 = arith.addf %117, %119 : vector<8x768xf32>
    %121 = vector.extract_strided_slice %120 {offsets = [0, 0], sizes = [8, 384], strides = [1, 1]} : vector<8x768xf32> to vector<8x384xf32>
    %c0_163 = arith.constant 0 : index
    %c128_164 = arith.constant 128 : index
    %122 = vector.load %arg16[%c0_163, %c128_164] : memref<8x1280xf32, #tpu.memory_space<vmem>>, vector<8x384xf32>
    tpu.vector_store %arg16[%c0_163, %c128_164], %121 {strides = array<i32>} : memref<8x1280xf32, #tpu.memory_space<vmem>>, vector<8x384xf32>,
    %123 = vector.extract_strided_slice %120 {offsets = [0, 384], sizes = [8, 384], strides = [1, 1]} : vector<8x768xf32> to vector<8x384xf32>
    %c0_165 = arith.constant 0 : index
    %c768_166 = arith.constant 768 : index
    %124 = vector.load %arg16[%c0_165, %c768_166] : memref<8x1280xf32, #tpu.memory_space<vmem>>, vector<8x384xf32>
    tpu.vector_store %arg16[%c0_165, %c768_166], %123 {strides = array<i32>} : memref<8x1280xf32, #tpu.memory_space<vmem>>, vector<8x384xf32>,
    %c0_167 = arith.constant 0 : index
    %c0_168 = arith.constant 0 : index
    %125 = vector.load %arg16[%c0_167, %c0_168] : memref<8x1280xf32, #tpu.memory_space<vmem>>, vector<8x1280xf32>
    %c0_169 = arith.constant 0 : index
    %c0_170 = arith.constant 0 : index
    %126 = vector.load %arg11[%c0_169, %c0_170] : memref<8x1xf32, #tpu.memory_space<vmem>>, vector<8x1xf32>
    %127 = vector.broadcast %126 : vector<8x1xf32> to vector<8x1280xf32>
    %128 = arith.mulf %125, %127 : vector<8x1280xf32>
    %c0_171 = arith.constant 0 : index
    %c0_172 = arith.constant 0 : index
    %129 = vector.load %arg12[%c0_171, %c0_172] : memref<8x1xf32, #tpu.memory_space<vmem>>, vector<8x1xf32>
    %130 = vector.broadcast %129 : vector<8x1xf32> to vector<8x1280xf32>
    %131 = arith.addf %128, %130 : vector<8x1280xf32>
    %cst_173 = arith.constant 0.000000e+00 : f32
    %132 = vector.broadcast %cst_173 : f32 to vector<8x1280xf32>
    %133 = arith.maximumf %131, %132 : vector<8x1280xf32>
    %134 = arith.mulf %133, %2 : vector<8x1280xf32>
    %c0_174 = arith.constant 0 : index
    %c0_175 = arith.constant 0 : index
    %135 = vector.load %arg16[%c0_174, %c0_175] : memref<8x1280xf32, #tpu.memory_space<vmem>>, vector<8x1280xf32>
    tpu.vector_store %arg16[%c0_174, %c0_175], %134 {strides = array<i32>} : memref<8x1280xf32, #tpu.memory_space<vmem>>, vector<8x1280xf32>,
    %c0_176 = arith.constant 0 : index
    %c109_177 = arith.constant 109 : index
    %136 = vector.load %arg16[%c0_176, %c109_177] : memref<8x1280xf32, #tpu.memory_space<vmem>>, vector<8x384xf32>
    %c0_178 = arith.constant 0 : index
    %c0_179 = arith.constant 0 : index
    %137 = vector.load %arg17[%c0_178, %c0_179] : memref<72x768xf32, #tpu.memory_space<vmem>>, vector<8x384xf32>
    tpu.vector_store %arg17[%c0_178, %c0_179], %136 {strides = array<i32>} : memref<72x768xf32, #tpu.memory_space<vmem>>, vector<8x384xf32>,
    %c0_180 = arith.constant 0 : index
    %c110_181 = arith.constant 110 : index
    %138 = vector.load %arg16[%c0_180, %c110_181] : memref<8x1280xf32, #tpu.memory_space<vmem>>, vector<8x384xf32>
    %c8_182 = arith.constant 8 : index
    %c0_183 = arith.constant 0 : index
    %139 = vector.load %arg17[%c8_182, %c0_183] : memref<72x768xf32, #tpu.memory_space<vmem>>, vector<8x384xf32>
    tpu.vector_store %arg17[%c8_182, %c0_183], %138 {strides = array<i32>} : memref<72x768xf32, #tpu.memory_space<vmem>>, vector<8x384xf32>,
    %c0_184 = arith.constant 0 : index
    %c111_185 = arith.constant 111 : index
    %140 = vector.load %arg16[%c0_184, %c111_185] : memref<8x1280xf32, #tpu.memory_space<vmem>>, vector<8x384xf32>
    %c16_186 = arith.constant 16 : index
    %c0_187 = arith.constant 0 : index
    %141 = vector.load %arg17[%c16_186, %c0_187] : memref<72x768xf32, #tpu.memory_space<vmem>>, vector<8x384xf32>
    tpu.vector_store %arg17[%c16_186, %c0_187], %140 {strides = array<i32>} : memref<72x768xf32, #tpu.memory_space<vmem>>, vector<8x384xf32>,
    %c0_188 = arith.constant 0 : index
    %c127_189 = arith.constant 127 : index
    %142 = vector.load %arg16[%c0_188, %c127_189] : memref<8x1280xf32, #tpu.memory_space<vmem>>, vector<8x384xf32>
    %c24_190 = arith.constant 24 : index
    %c0_191 = arith.constant 0 : index
    %143 = vector.load %arg17[%c24_190, %c0_191] : memref<72x768xf32, #tpu.memory_space<vmem>>, vector<8x384xf32>
    tpu.vector_store %arg17[%c24_190, %c0_191], %142 {strides = array<i32>} : memref<72x768xf32, #tpu.memory_space<vmem>>, vector<8x384xf32>,
    %c0_192 = arith.constant 0 : index
    %c128_193 = arith.constant 128 : index
    %144 = vector.load %arg16[%c0_192, %c128_193] : memref<8x1280xf32, #tpu.memory_space<vmem>>, vector<8x384xf32>
    %c32_194 = arith.constant 32 : index
    %c0_195 = arith.constant 0 : index
    %145 = vector.load %arg17[%c32_194, %c0_195] : memref<72x768xf32, #tpu.memory_space<vmem>>, vector<8x384xf32>
    tpu.vector_store %arg17[%c32_194, %c0_195], %144 {strides = array<i32>} : memref<72x768xf32, #tpu.memory_space<vmem>>, vector<8x384xf32>,
    %c0_196 = arith.constant 0 : index
    %c129_197 = arith.constant 129 : index
    %146 = vector.load %arg16[%c0_196, %c129_197] : memref<8x1280xf32, #tpu.memory_space<vmem>>, vector<8x384xf32>
    %c40_198 = arith.constant 40 : index
    %c0_199 = arith.constant 0 : index
    %147 = vector.load %arg17[%c40_198, %c0_199] : memref<72x768xf32, #tpu.memory_space<vmem>>, vector<8x384xf32>
    tpu.vector_store %arg17[%c40_198, %c0_199], %146 {strides = array<i32>} : memref<72x768xf32, #tpu.memory_space<vmem>>, vector<8x384xf32>,
    %c0_200 = arith.constant 0 : index
    %c145_201 = arith.constant 145 : index
    %148 = vector.load %arg16[%c0_200, %c145_201] : memref<8x1280xf32, #tpu.memory_space<vmem>>, vector<8x384xf32>
    %c48_202 = arith.constant 48 : index
    %c0_203 = arith.constant 0 : index
    %149 = vector.load %arg17[%c48_202, %c0_203] : memref<72x768xf32, #tpu.memory_space<vmem>>, vector<8x384xf32>
    tpu.vector_store %arg17[%c48_202, %c0_203], %148 {strides = array<i32>} : memref<72x768xf32, #tpu.memory_space<vmem>>, vector<8x384xf32>,
    %c0_204 = arith.constant 0 : index
    %c146_205 = arith.constant 146 : index
    %150 = vector.load %arg16[%c0_204, %c146_205] : memref<8x1280xf32, #tpu.memory_space<vmem>>, vector<8x384xf32>
    %c56_206 = arith.constant 56 : index
    %c0_207 = arith.constant 0 : index
    %151 = vector.load %arg17[%c56_206, %c0_207] : memref<72x768xf32, #tpu.memory_space<vmem>>, vector<8x384xf32>
    tpu.vector_store %arg17[%c56_206, %c0_207], %150 {strides = array<i32>} : memref<72x768xf32, #tpu.memory_space<vmem>>, vector<8x384xf32>,
    %c0_208 = arith.constant 0 : index
    %c147_209 = arith.constant 147 : index
    %152 = vector.load %arg16[%c0_208, %c147_209] : memref<8x1280xf32, #tpu.memory_space<vmem>>, vector<8x384xf32>
    %c64_210 = arith.constant 64 : index
    %c0_211 = arith.constant 0 : index
    %153 = vector.load %arg17[%c64_210, %c0_211] : memref<72x768xf32, #tpu.memory_space<vmem>>, vector<8x384xf32>
    tpu.vector_store %arg17[%c64_210, %c0_211], %152 {strides = array<i32>} : memref<72x768xf32, #tpu.memory_space<vmem>>, vector<8x384xf32>,
    %c0_212 = arith.constant 0 : index
    %c749_213 = arith.constant 749 : index
    %154 = vector.load %arg16[%c0_212, %c749_213] : memref<8x1280xf32, #tpu.memory_space<vmem>>, vector<8x384xf32>
    %c0_214 = arith.constant 0 : index
    %c384_215 = arith.constant 384 : index
    %155 = vector.load %arg17[%c0_214, %c384_215] : memref<72x768xf32, #tpu.memory_space<vmem>>, vector<8x384xf32>
    tpu.vector_store %arg17[%c0_214, %c384_215], %154 {strides = array<i32>} : memref<72x768xf32, #tpu.memory_space<vmem>>, vector<8x384xf32>,
    %c0_216 = arith.constant 0 : index
    %c750_217 = arith.constant 750 : index
    %156 = vector.load %arg16[%c0_216, %c750_217] : memref<8x1280xf32, #tpu.memory_space<vmem>>, vector<8x384xf32>
    %c8_218 = arith.constant 8 : index
    %c384_219 = arith.constant 384 : index
    %157 = vector.load %arg17[%c8_218, %c384_219] : memref<72x768xf32, #tpu.memory_space<vmem>>, vector<8x384xf32>
    tpu.vector_store %arg17[%c8_218, %c384_219], %156 {strides = array<i32>} : memref<72x768xf32, #tpu.memory_space<vmem>>, vector<8x384xf32>,
    %c0_220 = arith.constant 0 : index
    %c751_221 = arith.constant 751 : index
    %158 = vector.load %arg16[%c0_220, %c751_221] : memref<8x1280xf32, #tpu.memory_space<vmem>>, vector<8x384xf32>
    %c16_222 = arith.constant 16 : index
    %c384_223 = arith.constant 384 : index
    %159 = vector.load %arg17[%c16_222, %c384_223] : memref<72x768xf32, #tpu.memory_space<vmem>>, vector<8x384xf32>
    tpu.vector_store %arg17[%c16_222, %c384_223], %158 {strides = array<i32>} : memref<72x768xf32, #tpu.memory_space<vmem>>, vector<8x384xf32>,
    %c0_224 = arith.constant 0 : index
    %c767_225 = arith.constant 767 : index
    %160 = vector.load %arg16[%c0_224, %c767_225] : memref<8x1280xf32, #tpu.memory_space<vmem>>, vector<8x384xf32>
    %c24_226 = arith.constant 24 : index
    %c384_227 = arith.constant 384 : index
    %161 = vector.load %arg17[%c24_226, %c384_227] : memref<72x768xf32, #tpu.memory_space<vmem>>, vector<8x384xf32>
    tpu.vector_store %arg17[%c24_226, %c384_227], %160 {strides = array<i32>} : memref<72x768xf32, #tpu.memory_space<vmem>>, vector<8x384xf32>,
    %c0_228 = arith.constant 0 : index
    %c768_229 = arith.constant 768 : index
    %162 = vector.load %arg16[%c0_228, %c768_229] : memref<8x1280xf32, #tpu.memory_space<vmem>>, vector<8x384xf32>
    %c32_230 = arith.constant 32 : index
    %c384_231 = arith.constant 384 : index
    %163 = vector.load %arg17[%c32_230, %c384_231] : memref<72x768xf32, #tpu.memory_space<vmem>>, vector<8x384xf32>
    tpu.vector_store %arg17[%c32_230, %c384_231], %162 {strides = array<i32>} : memref<72x768xf32, #tpu.memory_space<vmem>>, vector<8x384xf32>,
    %c0_232 = arith.constant 0 : index
    %c769_233 = arith.constant 769 : index
    %164 = vector.load %arg16[%c0_232, %c769_233] : memref<8x1280xf32, #tpu.memory_space<vmem>>, vector<8x384xf32>
    %c40_234 = arith.constant 40 : index
    %c384_235 = arith.constant 384 : index
    %165 = vector.load %arg17[%c40_234, %c384_235] : memref<72x768xf32, #tpu.memory_space<vmem>>, vector<8x384xf32>
    tpu.vector_store %arg17[%c40_234, %c384_235], %164 {strides = array<i32>} : memref<72x768xf32, #tpu.memory_space<vmem>>, vector<8x384xf32>,
    %c0_236 = arith.constant 0 : index
    %c785_237 = arith.constant 785 : index
    %166 = vector.load %arg16[%c0_236, %c785_237] : memref<8x1280xf32, #tpu.memory_space<vmem>>, vector<8x384xf32>
    %c48_238 = arith.constant 48 : index
    %c384_239 = arith.constant 384 : index
    %167 = vector.load %arg17[%c48_238, %c384_239] : memref<72x768xf32, #tpu.memory_space<vmem>>, vector<8x384xf32>
    tpu.vector_store %arg17[%c48_238, %c384_239], %166 {strides = array<i32>} : memref<72x768xf32, #tpu.memory_space<vmem>>, vector<8x384xf32>,
    %c0_240 = arith.constant 0 : index
    %c786_241 = arith.constant 786 : index
    %168 = vector.load %arg16[%c0_240, %c786_241] : memref<8x1280xf32, #tpu.memory_space<vmem>>, vector<8x384xf32>
    %c56_242 = arith.constant 56 : index
    %c384_243 = arith.constant 384 : index
    %169 = vector.load %arg17[%c56_242, %c384_243] : memref<72x768xf32, #tpu.memory_space<vmem>>, vector<8x384xf32>
    tpu.vector_store %arg17[%c56_242, %c384_243], %168 {strides = array<i32>} : memref<72x768xf32, #tpu.memory_space<vmem>>, vector<8x384xf32>,
    %c0_244 = arith.constant 0 : index
    %c787_245 = arith.constant 787 : index
    %170 = vector.load %arg16[%c0_244, %c787_245] : memref<8x1280xf32, #tpu.memory_space<vmem>>, vector<8x384xf32>
    %c64_246 = arith.constant 64 : index
    %c384_247 = arith.constant 384 : index
    %171 = vector.load %arg17[%c64_246, %c384_247] : memref<72x768xf32, #tpu.memory_space<vmem>>, vector<8x384xf32>
    tpu.vector_store %arg17[%c64_246, %c384_247], %170 {strides = array<i32>} : memref<72x768xf32, #tpu.memory_space<vmem>>, vector<8x384xf32>,
    %c0_248 = arith.constant 0 : index
    %c0_249 = arith.constant 0 : index
    %172 = vector.load %arg13[%c0_248, %c0_249] : memref<8x72xf32, #tpu.memory_space<vmem>>, vector<8x72xf32>
    %c0_250 = arith.constant 0 : index
    %c0_251 = arith.constant 0 : index
    %173 = vector.load %arg17[%c0_250, %c0_251] : memref<72x768xf32, #tpu.memory_space<vmem>>, vector<72x768xf32>
    %cst_252 = arith.constant dense<0.000000e+00> : vector<8x768xf32>
    %174 = tpu.matmul %172, %173, %cst_252 {dimension_numbers = #tpu.dot_dimension_numbers<[1], [0], [0], [1], [0, 0, 1, 1], [], []>} : vector<8x72xf32>, vector<72x768xf32>, vector<8x768xf32> -> vector<8x768xf32>
    %c0_253 = arith.constant 0 : index
    %c0_254 = arith.constant 0 : index
    %175 = vector.load %arg14[%c0_253, %c0_254] : memref<8x1xf32, #tpu.memory_space<vmem>>, vector<8x1xf32>
    %176 = vector.broadcast %175 : vector<8x1xf32> to vector<8x768xf32>
    %177 = arith.addf %174, %176 : vector<8x768xf32>
    %178 = vector.extract_strided_slice %177 {offsets = [0, 0], sizes = [8, 384], strides = [1, 1]} : vector<8x768xf32> to vector<8x384xf32>
    %c0_255 = arith.constant 0 : index
    %c0_256 = arith.constant 0 : index
    %c0_257 = arith.constant 0 : index
    %179 = vector.load %arg15[%c0_255, %c0_256, %c0_257] : memref<2x12x384xf32, #tpu.memory_space<vmem>>, vector<1x8x384xf32>
    %180 = vector.shape_cast %179 : vector<1x8x384xf32> to vector<8x384xf32>
    %181 = vector.shape_cast %178 : vector<8x384xf32> to vector<1x8x384xf32>
    tpu.vector_store %arg15[%c0_255, %c0_256, %c0_257], %181 {strides = array<i32>} : memref<2x12x384xf32, #tpu.memory_space<vmem>>, vector<1x8x384xf32>,
    %c0_258 = arith.constant 0 : index
    %c0_259 = arith.constant 0 : index
    %c0_260 = arith.constant 0 : index
    %182 = vector.load %arg1[%c0_258, %c0_259, %c0_260] : memref<2x4x640xf32, #tpu.memory_space<vmem>>, vector<1x4x640xf32>
    %183 = vector.shape_cast %182 : vector<1x4x640xf32> to vector<4x640xf32>
    %184 = vector.extract_strided_slice %183 {offsets = [0, 128], sizes = [4, 384], strides = [1, 1]} : vector<4x640xf32> to vector<4x384xf32>
    %c0_261 = arith.constant 0 : index
    %c8_262 = arith.constant 8 : index
    %c0_263 = arith.constant 0 : index
    %185 = vector.load %arg15[%c0_261, %c8_262, %c0_263] : memref<2x12x384xf32, #tpu.memory_space<vmem>>, vector<1x4x384xf32>
    %186 = vector.shape_cast %185 : vector<1x4x384xf32> to vector<4x384xf32>
    %187 = vector.shape_cast %184 : vector<4x384xf32> to vector<1x4x384xf32>
    tpu.vector_store %arg15[%c0_261, %c8_262, %c0_263], %187 {strides = array<i32>} : memref<2x12x384xf32, #tpu.memory_space<vmem>>, vector<1x4x384xf32>,
    %188 = vector.extract_strided_slice %177 {offsets = [0, 384], sizes = [8, 384], strides = [1, 1]} : vector<8x768xf32> to vector<8x384xf32>
    %c1_264 = arith.constant 1 : index
    %c0_265 = arith.constant 0 : index
    %c0_266 = arith.constant 0 : index
    %189 = vector.load %arg15[%c1_264, %c0_265, %c0_266] : memref<2x12x384xf32, #tpu.memory_space<vmem>>, vector<1x8x384xf32>
    %190 = vector.shape_cast %189 : vector<1x8x384xf32> to vector<8x384xf32>
    %191 = vector.shape_cast %188 : vector<8x384xf32> to vector<1x8x384xf32>
    tpu.vector_store %arg15[%c1_264, %c0_265, %c0_266], %191 {strides = array<i32>} : memref<2x12x384xf32, #tpu.memory_space<vmem>>, vector<1x8x384xf32>,
    %c1_267 = arith.constant 1 : index
    %c0_268 = arith.constant 0 : index
    %c0_269 = arith.constant 0 : index
    %192 = vector.load %arg1[%c1_267, %c0_268, %c0_269] : memref<2x4x640xf32, #tpu.memory_space<vmem>>, vector<1x4x640xf32>
    %193 = vector.shape_cast %192 : vector<1x4x640xf32> to vector<4x640xf32>
    %194 = vector.extract_strided_slice %193 {offsets = [0, 128], sizes = [4, 384], strides = [1, 1]} : vector<4x640xf32> to vector<4x384xf32>
    %c1_270 = arith.constant 1 : index
    %c8_271 = arith.constant 8 : index
    %c0_272 = arith.constant 0 : index
    %195 = vector.load %arg15[%c1_270, %c8_271, %c0_272] : memref<2x12x384xf32, #tpu.memory_space<vmem>>, vector<1x4x384xf32>
    %196 = vector.shape_cast %195 : vector<1x4x384xf32> to vector<4x384xf32>
    %197 = vector.shape_cast %194 : vector<4x384xf32> to vector<1x4x384xf32>
    tpu.vector_store %arg15[%c1_270, %c8_271, %c0_272], %197 {strides = array<i32>} : memref<2x12x384xf32, #tpu.memory_space<vmem>>, vector<1x4x384xf32>,
    return
  }
  func.func @transform_0(%arg0: i32) -> (i32, i32, i32) {
    %c0_i32 = arith.constant 0 : i32
    %c0_i32_0 = arith.constant 0 : i32
    %c0_i32_1 = arith.constant 0 : i32
    return %arg0, %c0_i32, %c0_i32_0 : i32, i32, i32
  }
  func.func @transform_1(%arg0: i32) -> (i32, i32) {
    %c0_i32 = arith.constant 0 : i32
    %c0_i32_0 = arith.constant 0 : i32
    %c0_i32_1 = arith.constant 0 : i32
    return %c0_i32, %c0_i32_0 : i32, i32
  }
  func.func @transform_2(%arg0: i32) -> (i32, i32) {
    %c0_i32 = arith.constant 0 : i32
    %c0_i32_0 = arith.constant 0 : i32
    %c0_i32_1 = arith.constant 0 : i32
    return %c0_i32, %c0_i32_0 : i32, i32
  }
  func.func @transform_3(%arg0: i32) -> (i32, i32) {
    %c0_i32 = arith.constant 0 : i32
    %c0_i32_0 = arith.constant 0 : i32
    %c0_i32_1 = arith.constant 0 : i32
    return %c0_i32, %c0_i32_0 : i32, i32
  }
  func.func @transform_4(%arg0: i32) -> (i32, i32) {
    %c0_i32 = arith.constant 0 : i32
    %c0_i32_0 = arith.constant 0 : i32
    %c0_i32_1 = arith.constant 0 : i32
    return %c0_i32, %c0_i32_0 : i32, i32
  }
  func.func @transform_5(%arg0: i32) -> (i32, i32) {
    %c0_i32 = arith.constant 0 : i32
    %c0_i32_0 = arith.constant 0 : i32
    %c0_i32_1 = arith.constant 0 : i32
    return %c0_i32, %c0_i32_0 : i32, i32
  }
  func.func @transform_6(%arg0: i32) -> (i32, i32) {
    %c0_i32 = arith.constant 0 : i32
    %c0_i32_0 = arith.constant 0 : i32
    %c0_i32_1 = arith.constant 0 : i32
    return %c0_i32, %c0_i32_0 : i32, i32
  }
  func.func @transform_7(%arg0: i32) -> (i32, i32) {
    %c0_i32 = arith.constant 0 : i32
    %c0_i32_0 = arith.constant 0 : i32
    %c0_i32_1 = arith.constant 0 : i32
    return %c0_i32, %c0_i32_0 : i32, i32
  }
  func.func @transform_8(%arg0: i32) -> (i32, i32) {
    %c0_i32 = arith.constant 0 : i32
    %c0_i32_0 = arith.constant 0 : i32
    %c0_i32_1 = arith.constant 0 : i32
    return %c0_i32, %c0_i32_0 : i32, i32
  }
  func.func @transform_9(%arg0: i32) -> (i32, i32) {
    %c0_i32 = arith.constant 0 : i32
    %c0_i32_0 = arith.constant 0 : i32
    %c0_i32_1 = arith.constant 0 : i32
    return %c0_i32, %c0_i32_0 : i32, i32
  }
  func.func @transform_10(%arg0: i32) -> (i32, i32) {
    %c0_i32 = arith.constant 0 : i32
    %c0_i32_0 = arith.constant 0 : i32
    %c0_i32_1 = arith.constant 0 : i32
    return %c0_i32, %c0_i32_0 : i32, i32
  }
  func.func @transform_11(%arg0: i32) -> (i32, i32) {
    %c0_i32 = arith.constant 0 : i32
    %c0_i32_0 = arith.constant 0 : i32
    %c0_i32_1 = arith.constant 0 : i32
    return %c0_i32, %c0_i32_0 : i32, i32
  }
  func.func @transform_12(%arg0: i32) -> (i32, i32) {
    %c0_i32 = arith.constant 0 : i32
    %c0_i32_0 = arith.constant 0 : i32
    %c0_i32_1 = arith.constant 0 : i32
    return %c0_i32, %c0_i32_0 : i32, i32
  }
  func.func @transform_13(%arg0: i32) -> (i32, i32) {
    %c0_i32 = arith.constant 0 : i32
    %c0_i32_0 = arith.constant 0 : i32
    %c0_i32_1 = arith.constant 0 : i32
    return %c0_i32, %c0_i32_0 : i32, i32
  }
  func.func @transform_14(%arg0: i32) -> (i32, i32, i32) {
    %c0_i32 = arith.constant 0 : i32
    %c0_i32_0 = arith.constant 0 : i32
    %c0_i32_1 = arith.constant 0 : i32
    return %arg0, %c0_i32, %c0_i32_0 : i32, i32, i32
  }
}

</mosaic_0001>

<bundles_post_ra>
// kernel: tpu_custom_call.1
= control target key start
LH: loop header
LB: loop body
LE: loop exit
PB: predicated region body
PF: predicated region fallthrough
CT: control target
= control target key end

     0   :  { %19 = vsyncpa [#allocation5], 0  ;;  %s2772_s16 = smov [#allocation4]   ;;  %s2773_s18 = smov 320   ;;  %s3709_s0 = inlined_call_operand.hbm [shape: f32[2,4,640], index: 0, kind: input, shape index: {}]   ;;  %s3710_s1 = inlined_call_operand.vmem [shape: f32[1,1280], index: 1, kind: input, shape index: {}]   ;;  %s3711_s2 = inlined_call_operand.vmem [shape: f32[8,1], index: 2, kind: input, shape index: {}]   ;;  %s3712_s3 = inlined_call_operand.vmem [shape: f32[8,1], index: 3, kind: input, shape index: {}]   ;;  %s3713_s4 = inlined_call_operand.vmem [shape: f32[8,72], index: 4, kind: input, shape index: {}]   ;;  %s3714_s5 = inlined_call_operand.vmem [shape: f32[8,1], index: 5, kind: input, shape index: {}]   ;;  %s3715_s6 = inlined_call_operand.vmem [shape: f32[8,1], index: 6, kind: input, shape index: {}]   ;;  %s3716_s7 = inlined_call_operand.vmem [shape: f32[8,1], index: 7, kind: input, shape index: {}]   ;;  %s3717_s8 = inlined_call_operand.vmem [shape: f32[8,72], index: 8, kind: input, shape index: {}]   ;;  %s3718_s9 = inlined_call_operand.vmem [shape: f32[8,1], index: 9, kind: input, shape index: {}]   ;;  %s3719_s10 = inlined_call_operand.vmem [shape: f32[8,1], index: 10, kind: input, shape index: {}]   ;;  %s3720_s11 = inlined_call_operand.vmem [shape: f32[8,1], index: 11, kind: input, shape index: {}]   ;;  %s3721_s12 = inlined_call_operand.vmem [shape: f32[8,72], index: 12, kind: input, shape index: {}]   ;;  %s3722_s13 = inlined_call_operand.vmem [shape: f32[8,1], index: 13, kind: input, shape index: {}]   ;;  %s3723_s14 = inlined_call_operand.vmem [shape: f32[2,12,384], index: 14, kind: output, shape index: {}]  }
   0x1   :  { %s24_s15 = sshll.u32 %s3709_s0, 4  ;;  %s26_s17 = sshll.u32 %s2772_s16, 4  ;;  %s25_s15 = int_to_ptr.hbm [resolvable:$true] %s24_s15  ;;  %s27_s17 = int_to_ptr.vmem [resolvable:$true] %s26_s17 }
   0x2   :  { %s2774_s19 = smov 20  }
   0x3   :  { %32 = dma.hbm_to_vmem [thread:$0]  %s25_s15, 640, %s27_s17, [#allocation5], %s2773_s18, %s2773_s18, %s2774_s19  }
   0x4   :  { %2770 = dma.done.wait [#allocation5], 640  }
   0x5   :  { %2771 = vsyncadd [#allocation5], 4294966656  ;;  %v2775_v0 = vmov 0   ;;  %v2776_v1 = vmov 0.0   ;;  %v160_v2 = vld [vmem:[%s3711_s2] sm:$0xff]  ;;  %v2178_v3 = vld [vmem:[#allocation4] sm:$0xff] }
   0x6   :  { %2263 = vset.pattern.permute.xlu0 %v2775_v0  ;;  %87 = vst [vmem:[#allocation2 + $0x30] sm:$0xf0] %v2776_v1  ;;  %2425 = vset.pattern.permute.xlu2 %v2775_v0  ;;  %v2179_v4 = vld [vmem:[#allocation4 + $0x8] sm:$0xff]  ;;  %v2182_v5 = vrot.slane %v2178_v3, 4  ;;  %vm2184_vm0 = vcmask 1043456   ;;  %v2202_v13 = vld [vmem:[#allocation4 + $0x14] sm:$0xff] }
   0x7   :  { %88 = vst [vmem:[#allocation2] sm:$0xf0] %v2776_v1  ;;  %2424 = vset.pattern.permute.xlu1 %v2775_v0  ;;  %163 = vperm.xlu0 %2263, %v160_v2   ;;  %v2183_v6 = vrot.slane %v2179_v4, 4  ;;  %v176_v8 = vld [vmem:[%s3712_s3] sm:$0xff]  ;;  %v99_v9 = vld [vmem:[#allocation4 + $0x10] sm:$0xf] }
   0x8   :  { %89 = vst [vmem:[#allocation2 + $0x18] sm:$0xf0] %v2776_v1  ;;  %v2203_v15 = vld [vmem:[#allocation4 + $0x1c] sm:$0xff]  ;;  %v126_v17 = vld [vmem:[#allocation4 + $0x24] sm:$0xf]  ;;  %v2206_v23 = vrot.slane %v2202_v13, 4 }
   0x9   :  { %90 = vst [vmem:[#allocation2 + $0x10] sm:$0xf0] %v2776_v1  ;;  %v2185_v7 = vsel %vm2184_vm0, %v2182_v5, %v2183_v6  ;;  %v2207_v24 = vrot.slane %v2203_v15, 4  ;;  %v2896_v39 = vld [vmem:[%s3710_s1] sm:$0xff]  ;;  %s2777_s19 = smov 109   ;;  %s2778_s0 = smov 110  }
   0xa   :  { %91 = vst [vmem:[#allocation2 + $0x48] sm:$0xf0] %v2776_v1  ;;  %v2905_v45 = vperm.slane %v2896_v39, 1  ;;  %v2908_v46 = vperm.slane %v2896_v39, 2  ;;  %v2919_v53 = vperm.slane %v2896_v39, 3  ;;  %v2922_v55 = vperm.slane %v2896_v39, 4 }
   0xb   :  { %92 = vst [vmem:[#allocation2 + $0x28] sm:$0xf0] %v2776_v1  ;;  %v2208_v26 = vsel %vm2184_vm0, %v2206_v23, %v2207_v24  ;;  %s2779_s20 = smov 111   ;;  %v2941_v5 = vperm.slane %v2896_v39, 0  ;;  %s2780_s21 = smov 127   ;;  %vm426_vm1 = vcmask 891904  }
   0xc   :  { %93 = vst [vmem:[#allocation2 + $0x8] sm:$0xf0] %v2776_v1  ;;  %s2782_s3 = smov 17   ;;  %s2783_s23 = smov 18   ;;  %vm400_vm2 = vcmask 900096   ;;  %vm374_vm3 = vcmask 908288  }
   0xd   :  { %94 = vst [vmem:[#allocation2 + $0x20] sm:$0xf0] %v2776_v1  ;;  %s2784_s24 = smov 19   ;;  %vm348_vm4 = vcmask 1039360   ;;  %vm316_vm5 = vcmask 7168   ;;  %vm290_vm6 = vcmask 138240  }
   0xe   :  { %95 = vst [vmem:[#allocation2 + $0x40] sm:$0xf0] %v2776_v1  ;;  %vm264_vm7 = vcmask 146432   ;;  %vm238_vm8 = vcmask 154624   ;;  %vm703_vm9 = vcmask 588800  }
   0xf   :  { %96 = vst [vmem:[#allocation2 + $0x38] sm:$0xf0] %v2776_v1  ;;  %179 = vperm.xlu0 %2263, %v176_v8  }
  0x10   :  { %103 = vst [vmem:[#allocation1] ss:$2 sm:$0xff] %v2178_v3 }
  0x11   :  { %105 = vst [vmem:[#allocation1 + $0x10] ss:$2 sm:$0xff] %v2179_v4 }
  0x12   :  { %107 = vst [vmem:[#allocation1 + $0x20] ss:$2 sm:$0xff] %v99_v9 }
  0x17   :  { %v108_v10 = vld.sshfl [vmem:[#allocation1] sm:$0xff pattern:$0x75316420]  ;;  %v109_v11 = vld.sshfl [vmem:[#allocation1 + $0x8] sm:$0xff pattern:$0x75316420] }
  0x18   :  { %118 = vst [vmem:[#allocation2 + $0x30] sm:$0xf] %v108_v10  ;;  %v110_v12 = vld.sshfl [vmem:[#allocation1 + $0x10] sm:$0xff pattern:$0x75316420] }
  0x19   :  { %119 = vst [vmem:[#allocation2] sm:$0xf] %v109_v11  ;;  %v111_v14 = vld.sshfl [vmem:[#allocation1 + $0x18] sm:$0xff pattern:$0x75316420] }
  0x1a   :  { %120 = vst [vmem:[#allocation2 + $0x18] sm:$0xf] %v110_v12  ;;  %v112_v16 = vld.sshfl [vmem:[#allocation1 + $0x20] sm:$0xff pattern:$0x75316420] }
  0x1b   :  { %121 = vst [vmem:[#allocation2 + $0x10] sm:$0xf] %v111_v14  ;;  %v64_v10 = vld [vmem:[%s3710_s1 + $0x8] sm:$0x3]  ;;  %s2781_s1 = smov 1  }
  0x1c   :  { %122 = vst [vmem:[#allocation2 + $0x48] sm:$0xf] %v112_v16  ;;  %v2960_v16 = vperm.slane %v2896_v39, 6 }
  0x1d   :  { %130 = vst [vmem:[#allocation1] ss:$2 sm:$0xff] %v2202_v13 }
  0x1e   :  { %132 = vst [vmem:[#allocation1 + $0x10] ss:$2 sm:$0xff] %v2203_v15 }
  0x1f   :  { %134 = vst [vmem:[#allocation1 + $0x20] ss:$2 sm:$0xff] %v126_v17  ;;  %v150_v54 = vld [vmem:[#allocation2 + $0x30] sm:$0xff]  ;;  %v2963_v17 = vperm.slane %v2896_v39, 7 }
  0x20   :  { %v151_v33 = vld [vmem:[#allocation2] sm:$0xff] }
  0x21   :  { %v152_v34 = vld [vmem:[#allocation2 + $0x18] sm:$0xff] }
  0x22   :  { %v153_v35 = vld [vmem:[#allocation2 + $0x10] sm:$0xff] }
  0x23   :  { %v154_v36 = vld [vmem:[#allocation2 + $0x48] sm:$0xff] }
  0x24   :  { %v135_v18 = vld.sshfl [vmem:[#allocation1] sm:$0xff pattern:$0x75316420]  ;;  %v136_v19 = vld.sshfl [vmem:[#allocation1 + $0x8] sm:$0xff pattern:$0x75316420] }
  0x25   :  { %v137_v20 = vld.sshfl [vmem:[#allocation1 + $0x10] sm:$0xff pattern:$0x75316420]  ;;  %v138_v21 = vld.sshfl [vmem:[#allocation1 + $0x18] sm:$0xff pattern:$0x75316420] }
  0x26   :  { %145 = vst [vmem:[#allocation2 + $0x28] sm:$0xf] %v135_v18  ;;  %v139_v22 = vld.sshfl [vmem:[#allocation1 + $0x20] sm:$0xff pattern:$0x75316420]  ;;  %v2965_v18 = vperm.slane %v64_v10, 0 }
  0x27   :  { %146 = vst [vmem:[#allocation2 + $0x8] sm:$0xf] %v136_v19  ;;  %v2967_v19 = vperm.slane %v64_v10, 1 }
  0x28   :  { %147 = vst [vmem:[#allocation2 + $0x20] sm:$0xf] %v137_v20 }
  0x29   :  { %148 = vst [vmem:[#allocation2 + $0x40] sm:$0xf] %v138_v21 }
  0x2a   :  { %149 = vst [vmem:[#allocation2 + $0x38] sm:$0xf] %v139_v22 }
  0x2b   :  { %2186 = vst [vmem:[#allocation1] ss:$2 sm:$0xff] %v2185_v7 }
  0x2c   :  { %2188 = vst [vmem:[#allocation1 + $0x10] ss:$2 sm:$0xff] %v2183_v6 }
  0x2e   :  { %v156_v63 = vld [vmem:[#allocation2 + $0x8] sm:$0xff] }
  0x2f   :  { %v157_v0 = vld [vmem:[#allocation2 + $0x20] sm:$0xff] }
  0x30   :  { %v158_v1 = vld [vmem:[#allocation2 + $0x40] sm:$0xff] }
  0x31   :  { %v159_v2 = vld [vmem:[#allocation2 + $0x38] sm:$0xff] }
  0x32   :  { %v2189_v25 = vld.sshfl [vmem:[#allocation1] sm:$0xff pattern:$0x75316420]  ;;  %v2190_v27 = vld.sshfl [vmem:[#allocation1 + $0x8] sm:$0xff pattern:$0x75316420] }
  0x33   :  { %2195 = vst [vmem:[%s3723_s14 + $0x18] sm:$0xf] %v2189_v25  ;;  %v2191_v28 = vld.sshfl [vmem:[#allocation1 + $0x10] sm:$0xff pattern:$0x75316420] }
  0x34   :  { %2196 = vst [vmem:[%s3723_s14 + $0x20] sm:$0xf] %v2190_v27 }
  0x35   :  { %2197 = vst [vmem:[%s3723_s14 + $0x28] sm:$0xf] %v2191_v28 }
  0x36   :  { %2209 = vst [vmem:[#allocation1] ss:$2 sm:$0xff] %v2208_v26 }
  0x37   :  { %2211 = vst [vmem:[#allocation1 + $0x10] ss:$2 sm:$0xff] %v2207_v24 }
  0x3d   :  { %v2212_v29 = vld.sshfl [vmem:[#allocation1] sm:$0xff pattern:$0x75316420]  ;;  %v2213_v30 = vld.sshfl [vmem:[#allocation1 + $0x8] sm:$0xff pattern:$0x75316420] }
  0x3e   :  { %v2214_v31 = vld.sshfl [vmem:[#allocation1 + $0x10] sm:$0xff pattern:$0x75316420]  ;;  %2247 = vst [vmem:[%s3723_s14 + $0x48] sm:$0xf] %v2212_v29 }
  0x3f   :  { %2248 = vst [vmem:[%s3723_s14 + $0x50] sm:$0xf] %v2213_v30 }
  0x40   :  { %2249 = vst [vmem:[%s3723_s14 + $0x58] sm:$0xf] %v2214_v31 }
  0x79   :  { %v2889_v32 = vpop.permute.xlu0 %163 }
  0x7a   :  { %v167_v37 = vmul.f32 %v2889_v32, %v151_v33  ;;  %v168_v38 = vmul.f32 %v2889_v32, %v152_v34  ;;  %v169_v43 = vmul.f32 %v2889_v32, %v153_v35  ;;  %v170_v44 = vmul.f32 %v2889_v32, %v154_v36  ;;  %v155_v33 = vld [vmem:[#allocation2 + $0x28] sm:$0xff] }
  0x7b   :  { %v166_v59 = vmul.f32 %v2889_v32, %v150_v54  ;;  %v172_v4 = vmul.f32 %v2889_v32, %v156_v63  ;;  %v173_v7 = vmul.f32 %v2889_v32, %v157_v0  ;;  %v174_v8 = vmul.f32 %v2889_v32, %v158_v1 }
  0x7c   :  { %v175_v9 = vmul.f32 %v2889_v32, %v159_v2  ;;  %v171_v34 = vmul.f32 %v2889_v32, %v155_v33  ;;  %v3007_v36 = vperm.slane %v2896_v39, 5  ;;  %v859_v39 = vld [vmem:[%s3716_s7] sm:$0xff] }
  0x81   :  { %v2898_v40 = vpop.permute.xlu0 %179 }
  0x82   :  { %v183_v41 = vadd.f32 %v2898_v40, %v167_v37  ;;  %v184_v42 = vadd.f32 %v2898_v40, %v168_v38  ;;  %v185_v48 = vadd.f32 %v2898_v40, %v169_v43  ;;  %v186_v49 = vadd.f32 %v2898_v40, %v170_v44 }
  0x83   :  { %v182_v62 = vadd.f32 %v2898_v40, %v166_v59  ;;  %v188_v11 = vadd.f32 %v2898_v40, %v172_v4  ;;  %v189_v12 = vadd.f32 %v2898_v40, %v173_v7  ;;  %v190_v13 = vadd.f32 %v2898_v40, %v174_v8 }
  0x84   :  { %v193_v47 = vmax.f32 %v183_v41, 0.0  ;;  %v194_v50 = vmax.f32 %v184_v42, 0.0  ;;  %v195_v56 = vmax.f32 %v185_v48, 0.0  ;;  %v196_v57 = vmax.f32 %v186_v49, 0.0 }
  0x85   :  { %v192_v6 = vmax.f32 %v182_v62, 0.0  ;;  %v191_v14 = vadd.f32 %v2898_v40, %v175_v9  ;;  %v198_v20 = vmax.f32 %v188_v11, 0.0  ;;  %v199_v21 = vmax.f32 %v189_v12, 0.0 }
  0x86   :  { %v2913_v51 = vmul.f32 %v193_v47, %v2905_v45  ;;  %v2916_v52 = vmul.f32 %v194_v50, %v2908_v46  ;;  %v2931_v60 = vmul.f32 %v195_v56, %v2919_v53  ;;  %v2934_v61 = vmul.f32 %v196_v57, %v2922_v55 }
  0x87   :  { %v2957_v15 = vmul.f32 %v192_v6, %v2941_v5  ;;  %v200_v22 = vmax.f32 %v190_v13, 0.0  ;;  %v201_v23 = vmax.f32 %v191_v14, 0.0  ;;  %v2975_v25 = vmul.f32 %v198_v20, %v2960_v16 }
  0x88   :  { %v2264_v58 = vpack.i.bf16 %v2916_v52, %v2913_v51  ;;  %v2269_v3 = vpack.i.bf16 %v2934_v61, %v2931_v60  ;;  %v2978_v26 = vmul.f32 %v199_v21, %v2963_v17  ;;  %v2319_v31 = vpack.i.bf16 %v2931_v60, %v2916_v52 }
  0x89   :  { %v2314_v24 = vpack.i.bf16 %v2913_v51, %v2957_v15  ;;  %v2981_v27 = vmul.f32 %v200_v22, %v2965_v18  ;;  %v2984_v28 = vmul.f32 %v201_v23, %v2967_v19  ;;  %v187_v35 = vadd.f32 %v2898_v40, %v171_v34  ;;  %v843_v40 = vld [vmem:[%s3715_s6] sm:$0xff] }
  0x8a   :  { %2265 = vrot.lane.b32.xlu1 %v2264_v58, %s2777_s19  ;;  %2275 = vrot.lane.b32.xlu2 %v2264_v58, %s2778_s0  ;;  %v2304_v29 = vpack.i.bf16 %v2978_v26, %v2975_v25 }
  0x8b   :  { %2285 = vrot.lane.b32.xlu0 %v2264_v58, %s2779_s20  ;;  %v2309_v30 = vpack.i.bf16 %v2984_v28, %v2981_v27  ;;  %v197_v37 = vmax.f32 %v187_v35, 0.0  ;;  %v2389_v38 = vpack.i.bf16 %v2981_v27, %v2978_v26 }
  0x8d   :  { %v3015_v32 = vmul.f32 %v197_v37, %v3007_v36 }
  0x8f   :  { %v2384_v41 = vpack.i.bf16 %v2975_v25, %v3015_v32 }
  0x92   :  { %2270 = vrot.lane.b32.xlu1 %v2269_v3, %s2777_s19  ;;  %2280 = vrot.lane.b32.xlu2 %v2269_v3, %s2778_s0 }
  0x93   :  { %2300 = vrot.lane.b32.xlu0 %v2269_v3, %s2780_s21 }
  0x9a   :  { %2290 = vrot.lane.b32.xlu1 %v2269_v3, %s2779_s20  ;;  %2295 = vrot.lane.b32.xlu2 %v2264_v58, %s2780_s21 }
  0x9b   :  { %2315 = vrot.lane.b32.xlu0 %v2314_v24, %s2781_s1 }
  0xa2   :  { %2305 = vrot.lane.b32.xlu1 %v2304_v29, %s2777_s19  ;;  %2310 = vrot.lane.b32.xlu2 %v2309_v30, %s2777_s19 }
  0xa3   :  { %2330 = vrot.lane.b32.xlu0 %v2309_v30, %s2778_s0 }
  0xaa   :  { %2320 = vrot.lane.b32.xlu1 %v2319_v31, %s2781_s1  ;;  %2325 = vrot.lane.b32.xlu2 %v2304_v29, %s2778_s0 }
  0xab   :  { %2345 = vrot.lane.b32.xlu0 %v2304_v29, %s2779_s20 }
  0xb2   :  { %2340 = vrot.lane.b32.xlu2 %v2319_v31, %s2782_s3  ;;  %2335 = vrot.lane.b32.xlu1 %v2314_v24, %s2782_s3 }
  0xb3   :  { %2360 = vrot.lane.b32.xlu0 %v2319_v31, %s2783_s23 }
  0xba   :  { %2350 = vrot.lane.b32.xlu1 %v2309_v30, %s2779_s20  ;;  %2355 = vrot.lane.b32.xlu2 %v2314_v24, %s2783_s23 }
  0xbb   :  { %2375 = vrot.lane.b32.xlu0 %v2314_v24, %s2784_s24 }
  0xc2   :  { %2365 = vrot.lane.b32.xlu1 %v2304_v29, %s2780_s21  ;;  %2370 = vrot.lane.b32.xlu2 %v2309_v30, %s2780_s21 }
  0xc3   :  { %2390 = vrot.lane.b32.xlu0 %v2389_v38, %s2781_s1 }
  0xca   :  { %2380 = vrot.lane.b32.xlu1 %v2319_v31, %s2784_s24  ;;  %2385 = vrot.lane.b32.xlu2 %v2384_v41, %s2781_s1 }
  0xcb   :  { %2405 = vrot.lane.b32.xlu0 %v2384_v41, %s2783_s23 }
  0xd2   :  { %2395 = vrot.lane.b32.xlu1 %v2384_v41, %s2782_s3  ;;  %2400 = vrot.lane.b32.xlu2 %v2389_v38, %s2782_s3 }
  0xd3   :  { %2420 = vrot.lane.b32.xlu0 %v2389_v38, %s2784_s24 }
  0xda   :  { %2410 = vrot.lane.b32.xlu1 %v2389_v38, %s2783_s23  ;;  %2415 = vrot.lane.b32.xlu2 %v2384_v41, %s2784_s24 }
  0xdb   :  { %862 = vperm.xlu0 %2263, %v859_v39  }
  0xe2   :  { %846 = vperm.xlu2 %2425, %v843_v40  }
  0xe4   :  { %v2276_v42 = vpop.permute.xlu2 %2275 }
  0xe5   :  { %v2278_v48 = vunpack.i.h.bf16 %v2276_v42  ;;  %v2277_v49 = vunpack.i.l.bf16 %v2276_v42 }
  0xe7   :  { %v401_v1 = vsel %vm400_vm2, %v2277_v49, %v2278_v48 }
  0xec   :  { %v2281_v43 = vpop.permute.xlu2 %2280 }
  0xed   :  { %v2282_v4 = vunpack.i.l.bf16 %v2281_v43  ;;  %v2283_v10 = vunpack.i.h.bf16 %v2281_v43 }
  0xef   :  { %v402_v14 = vsel %vm400_vm2, %v2278_v48, %v2282_v4  ;;  %v403_v20 = vsel %vm400_vm2, %v2282_v4, %v2283_v10 }
  0xf4   :  { %v2296_v44 = vpop.permute.xlu2 %2295 }
  0xf5   :  { %v2298_v63 = vunpack.i.h.bf16 %v2296_v44  ;;  %v2297_v0 = vunpack.i.l.bf16 %v2296_v44 }
  0xf7   :  { %v349_v9 = vsel %vm348_vm4, %v2297_v0, %v2298_v63 }
  0xfc   :  { %v2266_v47 = vpop.permute.xlu1 %2265  ;;  %v3033_v57 = vpop.permute.xlu2 %2310 }
  0xfd   :  { %v2268_v50 = vunpack.i.h.bf16 %v2266_v47  ;;  %v2267_v54 = vunpack.i.l.bf16 %v2266_v47  ;;  %v2286_v56 = vpop.permute.xlu0 %2285 }
  0xfe   :  { %v2288_v58 = vunpack.i.h.bf16 %v2286_v56  ;;  %v2287_v59 = vunpack.i.l.bf16 %v2286_v56 }
  0xff   :  { %v427_v62 = vsel %vm426_vm1, %v2267_v54, %v2268_v50 }
 0x100   :  { %714 = vmatpush.msra.mxu0 %v427_v62  ;;  %v375_v2 = vsel %vm374_vm3, %v2287_v59, %v2288_v58 }
 0x102   :  { %715 = vmatpush.msra.mxu0 %v401_v1 }
 0x104   :  { %v2271_v3 = vpop.permute.xlu1 %2270  ;;  %716 = vmatpush.msra.mxu0 %v375_v2  ;;  %v3039_v11 = vpop.permute.xlu2 %2325 }
 0x105   :  { %v2273_v6 = vunpack.i.h.bf16 %v2271_v3  ;;  %v2272_v7 = vunpack.i.l.bf16 %v2271_v3  ;;  %v2301_v8 = vpop.permute.xlu0 %2300  ;;  %v2328_v40 = vunpack.i.h.bf16 %v3039_v11  ;;  %v2327_v42 = vunpack.i.l.bf16 %v3039_v11 }
 0x106   :  { %717 = vmatpush.msra.mxu0 %v349_v9  ;;  %v2303_v22 = vunpack.i.h.bf16 %v2301_v8  ;;  %v2302_v23 = vunpack.i.l.bf16 %v2301_v8 }
 0x107   :  { %v428_v12 = vsel %vm426_vm1, %v2268_v50, %v2272_v7  ;;  %v429_v13 = vsel %vm426_vm1, %v2272_v7, %v2273_v6  ;;  %v608_v49 = vsel %vm400_vm2, %v2327_v42, %v2328_v40 }
 0x108   :  { %718 = vmatpush.msra.mxu0 %v2913_v51  ;;  %734 = vmatpush.msra.mxu1 %v428_v12  ;;  %v350_v38 = vsel %vm348_vm4, %v2298_v63, %v2302_v23  ;;  %v351_v41 = vsel %vm348_vm4, %v2302_v23, %v2303_v22 }
 0x109   :  { %754 = vmatpush.msra.mxu2 %v429_v13 }
 0x10a   :  { %735 = vmatpush.msra.mxu1 %v402_v14 }
 0x10b   :  { %755 = vmatpush.msra.mxu2 %v403_v20 }
 0x10c   :  { %v2291_v21 = vpop.permute.xlu1 %2290  ;;  %v2341_v37 = vpop.permute.xlu2 %2340 }
 0x10d   :  { %v2293_v24 = vunpack.i.h.bf16 %v2291_v21  ;;  %v2292_v29 = vunpack.i.l.bf16 %v2291_v21  ;;  %v2316_v30 = vpop.permute.xlu0 %2315  ;;  %v2343_v54 = vunpack.i.h.bf16 %v2341_v37  ;;  %v2342_v56 = vunpack.i.l.bf16 %v2341_v37 }
 0x10e   :  { %v2318_v31 = vunpack.i.h.bf16 %v2316_v30  ;;  %v2317_v33 = vunpack.i.l.bf16 %v2316_v30  ;;  %v2312_v37 = vunpack.i.l.bf16 %v3033_v57 }
 0x10f   :  { %v376_v34 = vsel %vm374_vm3, %v2288_v58, %v2292_v29  ;;  %v377_v51 = vsel %vm374_vm3, %v2292_v29, %v2293_v24  ;;  %v293_v4 = vsel %vm290_vm6, %v2342_v56, %v2343_v54 }
 0x110   :  { %v317_v35 = vsel %vm316_vm5, %v2317_v33, %v2318_v31  ;;  %736 = vmatpush.msra.mxu1 %v376_v34  ;;  %756 = vmatpush.msra.mxu2 %v377_v51 }
 0x111   :  { %719 = vmatpush.msra.mxu0 %v317_v35  ;;  %v3082_v35 = vld [vmem:[%s3713_s4] sm:$0xff] }
 0x112   :  { %737 = vmatpush.msra.mxu1 %v350_v38  ;;  %757 = vmatpush.msra.mxu2 %v351_v41 }
 0x114   :  { %v3051_v39 = vpop.permute.xlu1 %2305  ;;  %738 = vmatpush.msra.mxu1 %v2916_v52  ;;  %758 = vmatpush.msra.mxu2 %v2931_v60  ;;  %v2356_v52 = vpop.permute.xlu2 %2355  ;;  %v697_v60 = vld [vmem:[%s3714_s5] sm:$0xff] }
 0x115   :  { %v2308_v43 = vunpack.i.h.bf16 %v3051_v39  ;;  %v2307_v44 = vunpack.i.l.bf16 %v3051_v39  ;;  %v3059_v47 = vpop.permute.xlu0 %2330  ;;  %700 = vperm.xlu1 %2424, %v697_v60   ;;  %v2358_v7 = vunpack.i.h.bf16 %v2356_v52  ;;  %v2357_v8 = vunpack.i.l.bf16 %v2356_v52 }
 0x116   :  { %v2332_v38 = vunpack.i.l.bf16 %v3059_v47 }
 0x117   :  { %v633_v48 = vsel %vm426_vm1, %v2307_v44, %v2308_v43  ;;  %v265_v24 = vsel %vm264_vm7, %v2357_v8, %v2358_v7  ;;  %v634_v42 = vsel %vm426_vm1, %v2308_v43, %v2312_v37 }
 0x118   :  { %774 = vmatpush.msra.mxu3 %v633_v48  ;;  %v609_v44 = vsel %vm400_vm2, %v2328_v40, %v2332_v38 }
 0x11a   :  { %775 = vmatpush.msra.mxu3 %v608_v49 }
 0x11c   :  { %v2321_v50 = vpop.permute.xlu1 %2320  ;;  %v3072_v9 = vpop.permute.xlu2 %2370 }
 0x11d   :  { %v2323_v58 = vunpack.i.h.bf16 %v2321_v50  ;;  %v2322_v59 = vunpack.i.l.bf16 %v2321_v50  ;;  %v2346_v62 = vpop.permute.xlu0 %2345  ;;  %v2372_v49 = vunpack.i.l.bf16 %v3072_v9 }
 0x11e   :  { %v2348_v63 = vunpack.i.h.bf16 %v2346_v62  ;;  %v2347_v0 = vunpack.i.l.bf16 %v2346_v62 }
 0x11f   :  { %v318_v1 = vsel %vm316_vm5, %v2318_v31, %v2322_v59  ;;  %v319_v2 = vsel %vm316_vm5, %v2322_v59, %v2323_v58 }
 0x120   :  { %739 = vmatpush.msra.mxu1 %v318_v1  ;;  %759 = vmatpush.msra.mxu2 %v319_v2  ;;  %v583_v3 = vsel %vm374_vm3, %v2347_v0, %v2348_v63  ;;  %v2313_v1 = vunpack.i.h.bf16 %v3033_v57  ;;  %v2373_v57 = vunpack.i.h.bf16 %v3072_v9 }
 0x121   :  { %776 = vmatpush.msra.mxu3 %v583_v3 }
 0x122   :  { %760 = vmatpush.msra.mxu2 %v293_v4  ;;  %v2333_v4 = vunpack.i.h.bf16 %v3059_v47 }
 0x124   :  { %v2336_v6 = vpop.permute.xlu1 %2335  ;;  %v2386_v51 = vpop.permute.xlu2 %2385 }
 0x125   :  { %v2361_v10 = vpop.permute.xlu0 %2360  ;;  %v2338_v12 = vunpack.i.h.bf16 %v2336_v6  ;;  %v2337_v13 = vunpack.i.l.bf16 %v2336_v6  ;;  %v2387_v58 = vunpack.i.l.bf16 %v2386_v51 }
 0x126   :  { %v2363_v14 = vunpack.i.h.bf16 %v2361_v10  ;;  %v2362_v20 = vunpack.i.l.bf16 %v2361_v10  ;;  %v610_v10 = vsel %vm400_vm2, %v2332_v38, %v2333_v4 }
 0x127   :  { %v291_v21 = vsel %vm290_vm6, %v2337_v13, %v2338_v12  ;;  %v292_v22 = vsel %vm290_vm6, %v2338_v12, %v2342_v56  ;;  %v2388_v56 = vunpack.i.h.bf16 %v2386_v51 }
 0x128   :  { %720 = vmatpush.msra.mxu0 %v291_v21  ;;  %740 = vmatpush.msra.mxu1 %v292_v22  ;;  %v267_v23 = vsel %vm264_vm7, %v2362_v20, %v2363_v14  ;;  %v266_v29 = vsel %vm264_vm7, %v2358_v7, %v2362_v20 }
 0x129   :  { %761 = vmatpush.msra.mxu2 %v267_v23  ;;  %v527_v40 = vsel %vm316_vm5, %v2387_v58, %v2388_v56 }
 0x12a   :  { %721 = vmatpush.msra.mxu0 %v265_v24  ;;  %741 = vmatpush.msra.mxu1 %v266_v29  ;;  %v560_v29 = vsel %vm348_vm4, %v2372_v49, %v2373_v57 }
 0x12c   :  { %v2351_v30 = vpop.permute.xlu1 %2350  ;;  %v2401_v11 = vpop.permute.xlu2 %2400 }
 0x12d   :  { %v2376_v31 = vpop.permute.xlu0 %2375  ;;  %v2352_v39 = vunpack.i.l.bf16 %v2351_v30  ;;  %v2402_v12 = vunpack.i.l.bf16 %v2401_v11 }
 0x12e   :  { %v2378_v33 = vunpack.i.h.bf16 %v2376_v31  ;;  %v2377_v34 = vunpack.i.l.bf16 %v2376_v31 }
 0x12f   :  { %v584_v54 = vsel %vm374_vm3, %v2348_v63, %v2352_v39 }
 0x130   :  { %v239_v41 = vsel %vm238_vm8, %v2377_v34, %v2378_v33  ;;  %v2403_v34 = vunpack.i.h.bf16 %v2401_v11 }
 0x131   :  { %722 = vmatpush.msra.mxu0 %v239_v41 }
 0x132   :  { %2226 = vmatmul.msk.f32.vlgmr.msra.gmra.mxu0 %vm703_vm9, %v3082_v35 }
 0x133   :  { %794 = vmatpush.msrb.mxu0 %v634_v42 }
 0x134   :  { %v2366_v48 = vpop.permute.xlu1 %2365  ;;  %v2416_v47 = vpop.permute.xlu2 %2415 }
 0x135   :  { %795 = vmatpush.msrb.mxu0 %v609_v44  ;;  %v2368_v52 = vunpack.i.h.bf16 %v2366_v48  ;;  %v2367_v60 = vunpack.i.l.bf16 %v2366_v48  ;;  %v2391_v50 = vpop.permute.xlu0 %2390  ;;  %v2418_v24 = vunpack.i.h.bf16 %v2416_v47 }
 0x136   :  { %v2392_v62 = vunpack.i.l.bf16 %v2391_v50  ;;  %v2393_v31 = vunpack.i.h.bf16 %v2391_v50 }
 0x137   :  { %796 = vmatpush.msrb.mxu0 %v584_v54  ;;  %v558_v59 = vsel %vm348_vm4, %v2367_v60, %v2368_v52  ;;  %v559_v43 = vsel %vm348_vm4, %v2368_v52, %v2372_v49  ;;  %v504_v49 = vsel %vm290_vm6, %v2402_v12, %v2403_v34 }
 0x138   :  { %777 = vmatpush.msra.mxu3 %v558_v59  ;;  %v528_v63 = vsel %vm316_vm5, %v2388_v56, %v2392_v62  ;;  %v529_v38 = vsel %vm316_vm5, %v2392_v62, %v2393_v31 }
 0x139   :  { %797 = vmatpush.msrb.mxu0 %v559_v43 }
 0x13a   :  { %778 = vmatpush.msra.mxu3 %v2975_v25  ;;  %v2353_v25 = vunpack.i.h.bf16 %v2351_v30  ;;  %v2417_v30 = vunpack.i.l.bf16 %v2416_v47 }
 0x13b   :  { %798 = vmatpush.msrb.mxu0 %v2978_v26  ;;  %v635_v26 = vsel %vm426_vm1, %v2312_v37, %v2313_v1 }
 0x13c   :  { %v2381_v0 = vpop.permute.xlu1 %2380  ;;  %779 = vmatpush.msra.mxu3 %v527_v40  ;;  %v585_v14 = vsel %vm374_vm3, %v2352_v39, %v2353_v25  ;;  %v452_v41 = vsel %vm238_vm8, %v2417_v30, %v2418_v24  ;;  %v3131_v43 = vpop.permute.xlu2 %846 }
 0x13d   :  { %v2383_v2 = vunpack.i.h.bf16 %v2381_v0  ;;  %v2382_v3 = vunpack.i.l.bf16 %v2381_v0  ;;  %799 = vmatpush.msrb.mxu0 %v528_v63  ;;  %v2406_v8 = vpop.permute.xlu0 %2405 }
 0x13e   :  { %v2408_v20 = vunpack.i.h.bf16 %v2406_v8  ;;  %v2407_v21 = vunpack.i.l.bf16 %v2406_v8 }
 0x13f   :  { %v240_v6 = vsel %vm238_vm8, %v2378_v33, %v2382_v3  ;;  %v241_v7 = vsel %vm238_vm8, %v2382_v3, %v2383_v2 }
 0x140   :  { %742 = vmatpush.msra.mxu1 %v240_v6  ;;  %762 = vmatpush.msra.mxu2 %v241_v7  ;;  %v477_v51 = vsel %vm264_vm7, %v2407_v21, %v2408_v20 }
 0x141   :  { %2227 = vmatmul.msk.f32.vlgmr.msra.gmra.mxu1 %vm703_vm9, %v3082_v35  ;;  %2228 = vmatmul.msk.f32.vlgmr.msra.gmra.mxu2 %vm703_vm9, %v3082_v35 }
 0x142   :  { %814 = vmatpush.msrb.mxu1 %v635_v26 }
 0x144   :  { %815 = vmatpush.msrb.mxu1 %v610_v10  ;;  %v2396_v13 = vpop.permute.xlu1 %2395 }
 0x145   :  { %v2398_v22 = vunpack.i.h.bf16 %v2396_v13  ;;  %v2397_v23 = vunpack.i.l.bf16 %v2396_v13  ;;  %v2421_v37 = vpop.permute.xlu0 %2420 }
 0x146   :  { %816 = vmatpush.msrb.mxu1 %v585_v14  ;;  %v2422_v42 = vunpack.i.l.bf16 %v2421_v37  ;;  %v2423_v52 = vunpack.i.h.bf16 %v2421_v37 }
 0x147   :  { %v502_v9 = vsel %vm290_vm6, %v2397_v23, %v2398_v22  ;;  %v503_v33 = vsel %vm290_vm6, %v2398_v22, %v2402_v12 }
 0x148   :  { %817 = vmatpush.msrb.mxu1 %v560_v29  ;;  %780 = vmatpush.msra.mxu3 %v502_v9  ;;  %v453_v50 = vsel %vm238_vm8, %v2418_v24, %v2422_v42  ;;  %v454_v54 = vsel %vm238_vm8, %v2422_v42, %v2423_v52 }
 0x149   :  { %800 = vmatpush.msrb.mxu0 %v503_v33 }
 0x14a   :  { %818 = vmatpush.msrb.mxu1 %v2981_v27  ;;  %781 = vmatpush.msra.mxu3 %v477_v51 }
 0x14c   :  { %819 = vmatpush.msrb.mxu1 %v529_v38  ;;  %v2411_v39 = vpop.permute.xlu1 %2410  ;;  %782 = vmatpush.msra.mxu3 %v452_v41 }
 0x14d   :  { %v2413_v44 = vunpack.i.h.bf16 %v2411_v39  ;;  %v2412_v48 = vunpack.i.l.bf16 %v2411_v39  ;;  %2229 = vmatmul.msk.f32.vlgmr.msra.gmra.mxu3 %vm703_vm9, %v3082_v35  ;;  %v3134_v11 = vpop.permute.xlu0 %862 }
 0x14e   :  { %820 = vmatpush.msrb.mxu1 %v504_v49 }
 0x14f   :  { %v478_v27 = vsel %vm264_vm7, %v2408_v20, %v2412_v48  ;;  %v479_v60 = vsel %vm264_vm7, %v2412_v48, %v2413_v44 }
 0x150   :  { %801 = vmatpush.msrb.mxu0 %v478_v27  ;;  %821 = vmatpush.msrb.mxu1 %v479_v60  ;;  %v853_v60 = vmul.f32 %v3131_v43, %v2934_v61 }
 0x152   :  { %802 = vmatpush.msrb.mxu0 %v453_v50  ;;  %822 = vmatpush.msrb.mxu1 %v454_v54  ;;  %v869_v54 = vadd.f32 %v3134_v11, %v853_v60 }
 0x153   :  { %2230 = vmatmul.msk.f32.vlgmr.msrb.gmra.mxu0 %vm703_vm9, %v3082_v35  ;;  %2231 = vmatmul.msk.f32.vlgmr.msrb.gmra.mxu1 %vm703_vm9, %v3082_v35  ;;  %v849_v35 = vmul.f32 %v3131_v43, %v2957_v15  ;;  %v858_v15 = vmul.f32 %v3131_v43, %v2984_v28 }
 0x155   :  { %v865_v6 = vadd.f32 %v3134_v11, %v849_v35  ;;  %v874_v10 = vadd.f32 %v3134_v11, %v858_v15 }
 0x157   :  { %v875_v26 = vmax.f32 %v865_v6, 0.0  ;;  %v884_v24 = vmax.f32 %v874_v10, 0.0 }
 0x159   :  { %v3156_v47 = vmul.f32 %v875_v26, %v2941_v5  ;;  %v3169_v33 = vmul.f32 %v884_v24, %v2967_v19 }
 0x187   :  { %v701_v56 = vpop.permute.xlu1 %700 }
 0x1af   :  { %v724_v58 = vpop.f32.mrf.mxu0 }
 0x1b0   :  { %v725_v59 = vadd.f32 %v724_v58, %v701_v56 }
 0x1b2   :  { %v850_v62 = vmul.f32 %v3131_v43, %v725_v59  ;;  %v879_v59 = vmax.f32 %v869_v54, 0.0 }
 0x1b4   :  { %v866_v63 = vadd.f32 %v3134_v11, %v850_v62  ;;  %v3208_v62 = vmul.f32 %v879_v59, %v2922_v55 }
 0x1b6   :  { %v876_v3 = vmax.f32 %v866_v63, 0.0 }
 0x1b8   :  { %v3143_v7 = vmul.f32 %v876_v3, %v2905_v45 }
 0x1ba   :  { %v2446_v22 = vpack.i.bf16 %v3143_v7, %v3156_v47 }
 0x1be   :  { %v744_v40 = vpop.f32.mrf.mxu1 }
 0x1bf   :  { %v745_v0 = vadd.f32 %v744_v40, %v701_v56 }
 0x1c1   :  { %v851_v1 = vmul.f32 %v3131_v43, %v745_v0  ;;  %v854_v0 = vmul.f32 %v3131_v43, %v3015_v32  ;;  %v1533_v32 = vld [vmem:[%s3720_s11] sm:$0xff] }
 0x1c3   :  { %v867_v2 = vadd.f32 %v3134_v11, %v851_v1  ;;  %v870_v63 = vadd.f32 %v3134_v11, %v854_v0 }
 0x1c4   :  { %v764_v57 = vpop.f32.mrf.mxu2 }
 0x1c5   :  { %v877_v4 = vmax.f32 %v867_v2, 0.0  ;;  %v765_v14 = vadd.f32 %v764_v57, %v701_v56  ;;  %v880_v1 = vmax.f32 %v870_v63, 0.0 }
 0x1c7   :  { %v3146_v25 = vmul.f32 %v877_v4, %v2908_v46  ;;  %v852_v30 = vmul.f32 %v3131_v43, %v765_v14  ;;  %v3227_v2 = vmul.f32 %v880_v1, %v3007_v36 }
 0x1c9   :  { %v2426_v8 = vpack.i.bf16 %v3146_v25, %v3143_v7  ;;  %v868_v51 = vadd.f32 %v3134_v11, %v852_v30 }
 0x1cb   :  { %2427 = vrot.lane.b32.xlu1 %v2426_v8, %s2777_s19  ;;  %2432 = vrot.lane.b32.xlu2 %v2426_v8, %s2778_s0  ;;  %v878_v39 = vmax.f32 %v868_v51, 0.0 }
 0x1cc   :  { %2437 = vrot.lane.b32.xlu0 %v2426_v8, %s2779_s20 }
 0x1cd   :  { %v3186_v44 = vmul.f32 %v878_v39, %v2919_v53 }
 0x1d0   :  { %v784_v12 = vpop.f32.mrf.mxu3  ;;  %v804_v13 = vpop.f32.mrf.mxu0 }
 0x1d1   :  { %v785_v20 = vadd.f32 %v784_v12, %v701_v56  ;;  %v805_v21 = vadd.f32 %v804_v13, %v701_v56  ;;  %v824_v49 = vpop.f32.mrf.mxu1 }
 0x1d2   :  { %v825_v52 = vadd.f32 %v824_v49, %v701_v56 }
 0x1d3   :  { %2442 = vrot.lane.b32.xlu1 %v2426_v8, %s2780_s21  ;;  %2447 = vrot.lane.b32.xlu2 %v2446_v22, %s2781_s1  ;;  %v855_v28 = vmul.f32 %v3131_v43, %v785_v20  ;;  %v856_v23 = vmul.f32 %v3131_v43, %v805_v21 }
 0x1d4   :  { %v857_v27 = vmul.f32 %v3131_v43, %v825_v52  ;;  %v1372_v43 = vld [vmem:[%s3718_s9] sm:$0xff] }
 0x1d5   :  { %v871_v29 = vadd.f32 %v3134_v11, %v855_v28  ;;  %v872_v9 = vadd.f32 %v3134_v11, %v856_v23 }
 0x1d6   :  { %v873_v50 = vadd.f32 %v3134_v11, %v857_v27  ;;  %v1517_v11 = vld [vmem:[%s3719_s10] sm:$0xff] }
 0x1d7   :  { %v881_v31 = vmax.f32 %v871_v29, 0.0  ;;  %v882_v41 = vmax.f32 %v872_v9, 0.0 }
 0x1d8   :  { %v883_v58 = vmax.f32 %v873_v50, 0.0 }
 0x1d9   :  { %v3172_v34 = vmul.f32 %v881_v31, %v2960_v16  ;;  %v3183_v42 = vmul.f32 %v882_v41, %v2963_v17 }
 0x1da   :  { %v3205_v56 = vmul.f32 %v883_v58, %v2965_v18  ;;  %v3297_v58 = vld [vmem:[%s3717_s8] sm:$0xff] }
 0x1db   :  { %2452 = vrot.lane.b32.xlu2 %v2446_v22, %s2782_s3  ;;  %v2471_v37 = vpack.i.bf16 %v3172_v34, %v3146_v25  ;;  %v2466_v38 = vpack.i.bf16 %v3169_v33, %v3172_v34  ;;  %v2511_v48 = vpack.i.bf16 %v3183_v42, %v3186_v44  ;;  %v2546_v40 = vpack.i.bf16 %v3186_v44, %v3183_v42 }
 0x1dc   :  { %v2541_v61 = vpack.i.bf16 %v3208_v62, %v3205_v56  ;;  %v2566_v3 = vpack.i.bf16 %v3205_v56, %v3227_v2 }
 0x1dd   :  { %2472 = vrot.lane.b32.xlu0 %v2471_v37, %s2781_s1  ;;  %2467 = vrot.lane.b32.xlu1 %v2466_v38, %s2777_s19 }
 0x1e3   :  { %2457 = vrot.lane.b32.xlu2 %v2446_v22, %s2783_s23 }
 0x1e5   :  { %2512 = vrot.lane.b32.xlu0 %v2511_v48, %s2778_s0  ;;  %2477 = vrot.lane.b32.xlu1 %v2466_v38, %s2778_s0 }
 0x1eb   :  { %2462 = vrot.lane.b32.xlu2 %v2446_v22, %s2784_s24 }
 0x1ed   :  { %2522 = vrot.lane.b32.xlu0 %v2511_v48, %s2779_s20  ;;  %2487 = vrot.lane.b32.xlu1 %v2466_v38, %s2779_s20 }
 0x1f3   :  { %2482 = vrot.lane.b32.xlu2 %v2471_v37, %s2782_s3 }
 0x1f5   :  { %2532 = vrot.lane.b32.xlu0 %v2511_v48, %s2780_s21  ;;  %2497 = vrot.lane.b32.xlu1 %v2466_v38, %s2780_s21 }
 0x1fb   :  { %2492 = vrot.lane.b32.xlu2 %v2471_v37, %s2783_s23 }
 0x1fd   :  { %2542 = vrot.lane.b32.xlu0 %v2541_v61, %s2780_s21  ;;  %2517 = vrot.lane.b32.xlu1 %v2541_v61, %s2777_s19 }
 0x203   :  { %2502 = vrot.lane.b32.xlu2 %v2511_v48, %s2777_s19 }
 0x205   :  { %2547 = vrot.lane.b32.xlu0 %v2546_v40, %s2781_s1  ;;  %2527 = vrot.lane.b32.xlu1 %v2541_v61, %s2778_s0 }
 0x20b   :  { %2507 = vrot.lane.b32.xlu2 %v2471_v37, %s2784_s24 }
 0x20d   :  { %2552 = vrot.lane.b32.xlu0 %v2546_v40, %s2782_s3  ;;  %2537 = vrot.lane.b32.xlu1 %v2541_v61, %s2779_s20 }
 0x213   :  { %2567 = vrot.lane.b32.xlu2 %v2566_v3, %s2781_s1 }
 0x215   :  { %2557 = vrot.lane.b32.xlu0 %v2546_v40, %s2783_s23  ;;  %2562 = vrot.lane.b32.xlu1 %v2546_v40, %s2784_s24 }
 0x21b   :  { %2582 = vrot.lane.b32.xlu2 %v2566_v3, %s2784_s24 }
 0x21d   :  { %2572 = vrot.lane.b32.xlu0 %v2566_v3, %s2782_s3  ;;  %2577 = vrot.lane.b32.xlu1 %v2566_v3, %s2783_s23 }
 0x223   :  { %1536 = vperm.xlu2 %2425, %v1533_v32  }
 0x225   :  { %v3246_v35 = vpop.permute.xlu2 %2432  ;;  %1375 = vperm.xlu0 %2263, %v1372_v43   ;;  %1520 = vperm.xlu1 %2424, %v1517_v11  }
 0x226   :  { %v2435_v15 = vunpack.i.h.bf16 %v3246_v35  ;;  %v2434_v57 = vunpack.i.l.bf16 %v3246_v35 }
 0x228   :  { %v1077_v22 = vsel %vm400_vm2, %v2434_v57, %v2435_v15 }
 0x22d   :  { %v3248_v4 = vpop.permute.xlu2 %2447 }
 0x22e   :  { %v2450_v31 = vunpack.i.h.bf16 %v3248_v4  ;;  %v2449_v9 = vunpack.i.l.bf16 %v3248_v4 }
 0x230   :  { %v996_v48 = vsel %vm316_vm5, %v2449_v9, %v2450_v31 }
 0x235   :  { %v3250_v6 = vpop.permute.xlu2 %2452 }
 0x236   :  { %v2455_v37 = vunpack.i.h.bf16 %v3250_v6  ;;  %v2454_v38 = vunpack.i.l.bf16 %v3250_v6 }
 0x238   :  { %v971_v60 = vsel %vm290_vm6, %v2454_v38, %v2455_v37 }
 0x23d   :  { %v2428_v8 = vpop.permute.xlu1 %2427  ;;  %v3252_v26 = vpop.permute.xlu2 %2457 }
 0x23e   :  { %v2430_v10 = vunpack.i.h.bf16 %v2428_v8  ;;  %v2429_v12 = vunpack.i.l.bf16 %v2428_v8  ;;  %v3256_v13 = vpop.permute.xlu0 %2437  ;;  %v2460_v41 = vunpack.i.h.bf16 %v3252_v26  ;;  %v2459_v39 = vunpack.i.l.bf16 %v3252_v26 }
 0x23f   :  { %v2440_v14 = vunpack.i.h.bf16 %v3256_v13  ;;  %v2439_v20 = vunpack.i.l.bf16 %v3256_v13 }
 0x240   :  { %v1102_v21 = vsel %vm426_vm1, %v2429_v12, %v2430_v10  ;;  %v946_v54 = vsel %vm264_vm7, %v2459_v39, %v2460_v41 }
 0x241   :  { %1388 = vmatpush.msrb.mxu2 %v1102_v21  ;;  %v1052_v28 = vsel %vm374_vm3, %v2439_v20, %v2440_v14 }
 0x243   :  { %1389 = vmatpush.msrb.mxu2 %v1077_v22 }
 0x245   :  { %1390 = vmatpush.msrb.mxu2 %v1052_v28  ;;  %v3263_v23 = vpop.permute.xlu1 %2442  ;;  %v3265_v24 = vpop.permute.xlu2 %2462 }
 0x246   :  { %v2445_v29 = vunpack.i.h.bf16 %v3263_v23  ;;  %v2444_v30 = vunpack.i.l.bf16 %v3263_v23  ;;  %v2465_v52 = vunpack.i.h.bf16 %v3265_v24  ;;  %v2464_v27 = vunpack.i.l.bf16 %v3265_v24 }
 0x248   :  { %v1027_v51 = vsel %vm348_vm4, %v2444_v30, %v2445_v29  ;;  %v921_v59 = vsel %vm238_vm8, %v2464_v27, %v2465_v52 }
 0x249   :  { %1391 = vmatpush.msrb.mxu2 %v1027_v51 }
 0x24b   :  { %1392 = vmatpush.msrb.mxu2 %v3143_v7 }
 0x24d   :  { %1393 = vmatpush.msrb.mxu2 %v996_v48  ;;  %v3280_v49 = vpop.permute.xlu2 %2482 }
 0x24f   :  { %v3287_v7 = vpop.permute.xlu0 %2472  ;;  %v3289_v50 = vpop.permute.xlu1 %2467  ;;  %1394 = vmatpush.msrb.mxu2 %v971_v60 }
 0x250   :  { %v2469_v32 = vunpack.i.l.bf16 %v3289_v50  ;;  %v2474_v27 = vunpack.i.l.bf16 %v3287_v7  ;;  %v2470_v6 = vunpack.i.h.bf16 %v3289_v50 }
 0x251   :  { %1395 = vmatpush.msrb.mxu2 %v946_v54  ;;  %v2484_v54 = vunpack.i.l.bf16 %v3280_v49 }
 0x253   :  { %1396 = vmatpush.msrb.mxu2 %v921_v59 }
 0x254   :  { %2232 = vmatmul.msk.f32.vlgmr.msrb.gmra.mxu2 %vm703_vm9, %v3297_v58 }
 0x255   :  { %v3304_v61 = vpop.permute.xlu2 %2492 }
 0x257   :  { %v3306_v40 = vpop.permute.xlu0 %2512  ;;  %v3308_v0 = vpop.permute.xlu1 %2477 }
 0x258   :  { %v2515_v43 = vunpack.i.h.bf16 %v3306_v40  ;;  %v2514_v11 = vunpack.i.l.bf16 %v3306_v40  ;;  %v2479_v35 = vunpack.i.l.bf16 %v3308_v0 }
 0x25a   :  { %v1078_v28 = vsel %vm400_vm2, %v2435_v15, %v2514_v11  ;;  %v1283_v23 = vsel %vm400_vm2, %v2479_v35, %v2515_v43  ;;  %v2475_v35 = vunpack.i.h.bf16 %v3287_v7 }
 0x25d   :  { %v2503_v63 = vpop.permute.xlu2 %2502 }
 0x25e   :  { %v2505_v1 = vunpack.i.h.bf16 %v2503_v63  ;;  %v2504_v3 = vunpack.i.l.bf16 %v2503_v63  ;;  %v2494_v63 = vunpack.i.l.bf16 %v3304_v61 }
 0x25f   :  { %v3314_v8 = vpop.permute.xlu0 %2522  ;;  %v3316_v57 = vpop.permute.xlu1 %2487 }
 0x260   :  { %v2525_v12 = vunpack.i.h.bf16 %v3314_v8  ;;  %v2524_v13 = vunpack.i.l.bf16 %v3314_v8  ;;  %v2489_v20 = vunpack.i.l.bf16 %v3316_v57  ;;  %v1103_v21 = vsel %vm426_vm1, %v2430_v10, %v2504_v3 }
 0x261   :  { %v1308_v22 = vsel %vm426_vm1, %v2469_v32, %v2505_v1  ;;  %1408 = vmatpush.msrb.mxu3 %v1103_v21 }
 0x262   :  { %1448 = vmatpush.msra.mxu1 %v1308_v22  ;;  %v1053_v10 = vsel %vm374_vm3, %v2440_v14, %v2524_v13  ;;  %v1258_v9 = vsel %vm374_vm3, %v2489_v20, %v2525_v12 }
 0x263   :  { %1409 = vmatpush.msrb.mxu3 %v1078_v28 }
 0x264   :  { %1449 = vmatpush.msra.mxu1 %v1283_v23 }
 0x265   :  { %v3329_v30 = vpop.permute.xlu2 %2507  ;;  %1410 = vmatpush.msrb.mxu3 %v1053_v10 }
 0x266   :  { %1450 = vmatpush.msra.mxu1 %v1258_v9  ;;  %v2509_v22 = vunpack.i.l.bf16 %v3329_v30  ;;  %v2510_v7 = vunpack.i.h.bf16 %v3329_v30 }
 0x267   :  { %v3337_v51 = vpop.permute.xlu0 %2532  ;;  %v3339_v15 = vpop.permute.xlu1 %2497 }
 0x268   :  { %v2535_v38 = vunpack.i.h.bf16 %v3337_v51  ;;  %v2534_v39 = vunpack.i.l.bf16 %v3337_v51  ;;  %v2499_v48 = vunpack.i.l.bf16 %v3339_v15 }
 0x26a   :  { %v1028_v14 = vsel %vm348_vm4, %v2445_v29, %v2534_v39  ;;  %v1233_v60 = vsel %vm348_vm4, %v2499_v48, %v2535_v38  ;;  %v997_v29 = vsel %vm316_vm5, %v2450_v31, %v2474_v27  ;;  %v947_v31 = vsel %vm264_vm7, %v2460_v41, %v2494_v63 }
 0x26b   :  { %1411 = vmatpush.msrb.mxu3 %v1028_v14  ;;  %1451 = vmatpush.msra.mxu1 %v1233_v60  ;;  %v2490_v14 = vunpack.i.h.bf16 %v3316_v57 }
 0x26d   :  { %v3352_v59 = vpop.permute.xlu2 %2567  ;;  %1412 = vmatpush.msrb.mxu3 %v3146_v25  ;;  %1452 = vmatpush.msra.mxu1 %v3172_v34  ;;  %v972_v34 = vsel %vm290_vm6, %v2455_v37, %v2484_v54  ;;  %v922_v37 = vsel %vm238_vm8, %v2465_v52, %v2509_v22 }
 0x26e   :  { %v2569_v32 = vunpack.i.l.bf16 %v3352_v59 }
 0x26f   :  { %v2543_v20 = vpop.permute.xlu0 %2542  ;;  %v2518_v21 = vpop.permute.xlu1 %2517  ;;  %1413 = vmatpush.msrb.mxu3 %v997_v29 }
 0x270   :  { %v2520_v25 = vunpack.i.h.bf16 %v2518_v21  ;;  %v2519_v28 = vunpack.i.l.bf16 %v2518_v21  ;;  %v1202_v4 = vsel %vm316_vm5, %v2569_v32, %v2475_v35  ;;  %v2545_v32 = vunpack.i.h.bf16 %v2543_v20 }
 0x271   :  { %1414 = vmatpush.msrb.mxu3 %v972_v34  ;;  %1453 = vmatpush.msra.mxu1 %v1202_v4  ;;  %v2544_v29 = vunpack.i.l.bf16 %v2543_v20  ;;  %v2485_v4 = vunpack.i.h.bf16 %v3280_v49 }
 0x272   :  { %v1104_v23 = vsel %vm426_vm1, %v2504_v3, %v2520_v25  ;;  %v1309_v10 = vsel %vm426_vm1, %v2505_v1, %v2519_v28  ;;  %v1310_v26 = vsel %vm426_vm1, %v2519_v28, %v2470_v6  ;;  %v2480_v3 = vunpack.i.h.bf16 %v3308_v0 }
 0x273   :  { %1415 = vmatpush.msrb.mxu3 %v947_v31  ;;  %1428 = vmatpush.msra.mxu0 %v1104_v23  ;;  %v2500_v28 = vunpack.i.h.bf16 %v3339_v15  ;;  %v1029_v20 = vsel %vm348_vm4, %v2534_v39, %v2545_v32  ;;  %v2570_v31 = vunpack.i.h.bf16 %v3352_v59  ;;  %v2495_v59 = vunpack.i.h.bf16 %v3304_v61 }
 0x274   :  { %1468 = vmatpush.msra.mxu2 %v1309_v10 }
 0x275   :  { %1416 = vmatpush.msrb.mxu3 %v922_v37  ;;  %v1235_v8 = vsel %vm348_vm4, %v2544_v29, %v2500_v28 }
 0x276   :  { %2233 = vmatmul.msk.f32.vlgmr.msrb.gmra.mxu3 %vm703_vm9, %v3297_v58 }
 0x277   :  { %1488 = vmatpush.msra.mxu3 %v1310_v26  ;;  %v2548_v41 = vpop.permute.xlu0 %2547  ;;  %v2528_v1 = vpop.permute.xlu1 %2527 }
 0x278   :  { %v2530_v9 = vunpack.i.h.bf16 %v2528_v1  ;;  %v2529_v50 = vunpack.i.l.bf16 %v2528_v1  ;;  %v2550_v57 = vunpack.i.h.bf16 %v2548_v41  ;;  %v2549_v34 = vunpack.i.l.bf16 %v2548_v41  ;;  %v2583_v41 = vpop.permute.xlu2 %2582 }
 0x27a   :  { %v1079_v48 = vsel %vm400_vm2, %v2514_v11, %v2530_v9  ;;  %v1284_v24 = vsel %vm400_vm2, %v2515_v43, %v2529_v50  ;;  %v1285_v52 = vsel %vm400_vm2, %v2529_v50, %v2480_v3  ;;  %v998_v39 = vsel %vm316_vm5, %v2474_v27, %v2550_v57 }
 0x27b   :  { %1429 = vmatpush.msra.mxu0 %v1079_v48  ;;  %1469 = vmatpush.msra.mxu2 %v1284_v24  ;;  %v1203_v6 = vsel %vm316_vm5, %v2475_v35, %v2549_v34  ;;  %v2585_v24 = vunpack.i.h.bf16 %v2583_v41 }
 0x27c   :  { %1489 = vmatpush.msra.mxu3 %v1285_v52 }
 0x27f   :  { %v3398_v60 = vpop.permute.xlu0 %2552  ;;  %v2538_v0 = vpop.permute.xlu1 %2537 }
 0x280   :  { %v2540_v21 = vunpack.i.h.bf16 %v2538_v0  ;;  %v2539_v25 = vunpack.i.l.bf16 %v2538_v0  ;;  %v2554_v15 = vunpack.i.l.bf16 %v3398_v60 }
 0x282   :  { %v1054_v40 = vsel %vm374_vm3, %v2524_v13, %v2540_v21  ;;  %v1259_v43 = vsel %vm374_vm3, %v2525_v12, %v2539_v25  ;;  %v1260_v11 = vsel %vm374_vm3, %v2539_v25, %v2490_v14  ;;  %v1234_v13 = vsel %vm348_vm4, %v2535_v38, %v2544_v29 }
 0x283   :  { %1430 = vmatpush.msra.mxu0 %v1054_v40  ;;  %1470 = vmatpush.msra.mxu2 %v1259_v43  ;;  %v2555_v12 = vunpack.i.h.bf16 %v3398_v60  ;;  %v1178_v26 = vsel %vm290_vm6, %v2485_v4, %v2554_v15  ;;  %v3465_v43 = vpop.permute.xlu2 %1536 }
 0x284   :  { %1490 = vmatpush.msra.mxu3 %v1260_v11 }
 0x285   :  { %1431 = vmatpush.msra.mxu0 %v1029_v20  ;;  %1471 = vmatpush.msra.mxu2 %v1234_v13 }
 0x286   :  { %1491 = vmatpush.msra.mxu3 %v1235_v8 }
 0x287   :  { %v2558_v23 = vpop.permute.xlu0 %2557  ;;  %v2563_v10 = vpop.permute.xlu1 %2562  ;;  %1432 = vmatpush.msra.mxu0 %v3186_v44  ;;  %1472 = vmatpush.msra.mxu2 %v3183_v42  ;;  %v1204_v44 = vsel %vm316_vm5, %v2549_v34, %v2570_v31 }
 0x288   :  { %v2560_v51 = vunpack.i.h.bf16 %v2558_v23  ;;  %v2559_v38 = vunpack.i.l.bf16 %v2558_v23  ;;  %1492 = vmatpush.msra.mxu3 %v3205_v56  ;;  %v2565_v37 = vunpack.i.h.bf16 %v2563_v10  ;;  %v2564_v42 = vunpack.i.l.bf16 %v2563_v10 }
 0x289   :  { %1433 = vmatpush.msra.mxu0 %v998_v39  ;;  %1473 = vmatpush.msra.mxu2 %v1203_v6  ;;  %v973_v56 = vsel %vm290_vm6, %v2484_v54, %v2555_v12 }
 0x28a   :  { %1493 = vmatpush.msra.mxu3 %v1204_v44  ;;  %v948_v27 = vsel %vm264_vm7, %v2494_v63, %v2560_v51  ;;  %v1153_v35 = vsel %vm264_vm7, %v2495_v59, %v2559_v38  ;;  %v923_v49 = vsel %vm238_vm8, %v2509_v22, %v2565_v37  ;;  %v1128_v54 = vsel %vm238_vm8, %v2510_v7, %v2564_v42 }
 0x28b   :  { %1434 = vmatpush.msra.mxu0 %v973_v56  ;;  %1474 = vmatpush.msra.mxu2 %v1178_v26  ;;  %v2584_v63 = vunpack.i.l.bf16 %v2583_v41  ;;  %v1129_v0 = vsel %vm238_vm8, %v2564_v42, %v2585_v24 }
 0x28d   :  { %1435 = vmatpush.msra.mxu0 %v948_v27  ;;  %1475 = vmatpush.msra.mxu2 %v1153_v35  ;;  %v1127_v60 = vsel %vm238_vm8, %v2584_v63, %v2510_v7 }
 0x28f   :  { %v2573_v1 = vpop.permute.xlu0 %2572  ;;  %v2578_v3 = vpop.permute.xlu1 %2577  ;;  %1436 = vmatpush.msra.mxu0 %v923_v49  ;;  %1476 = vmatpush.msra.mxu2 %v1128_v54 }
 0x290   :  { %v2575_v9 = vunpack.i.h.bf16 %v2573_v1  ;;  %v2574_v50 = vunpack.i.l.bf16 %v2573_v1  ;;  %v2580_v61 = vunpack.i.h.bf16 %v2578_v3  ;;  %v2579_v48 = vunpack.i.l.bf16 %v2578_v3  ;;  %2234 = vmatmul.msk.f32.vlgmr.msra.gmra.mxu0 %vm703_vm9, %v3297_v58  ;;  %2236 = vmatmul.msk.f32.vlgmr.msra.gmra.mxu2 %vm703_vm9, %v3297_v58 }
 0x292   :  { %v1177_v30 = vsel %vm290_vm6, %v2574_v50, %v2485_v4  ;;  %v1179_v22 = vsel %vm290_vm6, %v2554_v15, %v2575_v9  ;;  %v1152_v52 = vsel %vm264_vm7, %v2579_v48, %v2495_v59  ;;  %v1154_v14 = vsel %vm264_vm7, %v2559_v38, %v2580_v61 }
 0x293   :  { %1454 = vmatpush.msra.mxu1 %v1177_v30  ;;  %1494 = vmatpush.msra.mxu3 %v1179_v22 }
 0x295   :  { %1455 = vmatpush.msra.mxu1 %v1152_v52  ;;  %1495 = vmatpush.msra.mxu3 %v1154_v14 }
 0x297   :  { %v3453_v32 = vpop.permute.xlu1 %1520  ;;  %1456 = vmatpush.msra.mxu1 %v1127_v60  ;;  %1496 = vmatpush.msra.mxu3 %v1129_v0  ;;  %v1376_v12 = vpop.permute.xlu0 %1375  ;;  %v2046_v0 = vld [vmem:[%s3722_s13] sm:$0xff] }
 0x298   :  { %v1523_v29 = vmul.f32 %v3453_v32, %v3156_v47  ;;  %v1527_v21 = vmul.f32 %v3453_v32, %v3208_v62  ;;  %v1528_v25 = vmul.f32 %v3453_v32, %v3227_v2  ;;  %v1532_v40 = vmul.f32 %v3453_v32, %v3169_v33  ;;  %2235 = vmatmul.msk.f32.vlgmr.msra.gmra.mxu1 %vm703_vm9, %v3297_v58 }
 0x299   :  { %2237 = vmatmul.msk.f32.vlgmr.msra.gmra.mxu3 %vm703_vm9, %v3297_v58 }
 0x29a   :  { %v1539_v11 = vadd.f32 %v3465_v43, %v1523_v29  ;;  %v1543_v47 = vadd.f32 %v3465_v43, %v1527_v21  ;;  %v1544_v62 = vadd.f32 %v3465_v43, %v1528_v25  ;;  %v1548_v28 = vadd.f32 %v3465_v43, %v1532_v40 }
 0x29c   :  { %v1549_v2 = vmax.f32 %v1539_v11, 0.0  ;;  %v1553_v57 = vmax.f32 %v1543_v47, 0.0  ;;  %v1554_v34 = vmax.f32 %v1544_v62, 0.0  ;;  %v1558_v33 = vmax.f32 %v1548_v28, 0.0 }
 0x29e   :  { %v1559_v20 = vmul.f32 %v1549_v2, %v2941_v5  ;;  %v1563_v13 = vmul.f32 %v1553_v57, %v2922_v55  ;;  %v1564_v8 = vmul.f32 %v1554_v34, %v3007_v36  ;;  %v3477_v58 = vmul.f32 %v1558_v33, %v2967_v19 }
 0x2a0   :  { %1569 = vst [vmem:[#allocation2 + $0x30] sm:$0xff] %v1559_v20 }
 0x2a1   :  { %1573 = vst [vmem:[#allocation2 + $0x48] sm:$0xff] %v1563_v13 }
 0x2a2   :  { %1574 = vst [vmem:[#allocation2 + $0x28] sm:$0xff] %v1564_v8 }
 0x2a3   :  { %1578 = vst [vmem:[#allocation2 + $0x38] sm:$0xff] %v3477_v58 }
 0x2d7   :  { %v1398_v15 = vpop.f32.mrf.mxu2 }
 0x2d8   :  { %v1399_v4 = vadd.f32 %v1398_v15, %v1376_v12 }
 0x2da   :  { %v1524_v31 = vmul.f32 %v3453_v32, %v1399_v4 }
 0x2dc   :  { %v1540_v23 = vadd.f32 %v3465_v43, %v1524_v31 }
 0x2de   :  { %v1550_v5 = vmax.f32 %v1540_v23, 0.0 }
 0x2e0   :  { %v3483_v55 = vmul.f32 %v1550_v5, %v2905_v45 }
 0x2e2   :  { %1570 = vst [vmem:[#allocation2] sm:$0xff] %v3483_v55  ;;  %v2586_v19 = vpack.i.bf16 %v3483_v55, %v1559_v20 }
 0x2e4   :  { %2587 = vrot.lane.b32.xlu0 %v2586_v19, %s2784_s24 }
 0x2ec   :  { %2622 = vrot.lane.b32.xlu0 %v2586_v19, %s2783_s23 }
 0x2f9   :  { %v1418_v36 = vpop.f32.mrf.mxu3 }
 0x2fa   :  { %v1419_v10 = vadd.f32 %v1418_v36, %v1376_v12 }
 0x2fc   :  { %v1525_v51 = vmul.f32 %v3453_v32, %v1419_v10 }
 0x2fe   :  { %v1541_v38 = vadd.f32 %v3465_v43, %v1525_v51 }
 0x300   :  { %v1551_v39 = vmax.f32 %v1541_v38, 0.0 }
 0x302   :  { %v3492_v6 = vmul.f32 %v1551_v39, %v2908_v46 }
 0x304   :  { %1571 = vst [vmem:[#allocation2 + $0x18] sm:$0xff] %v3492_v6  ;;  %v2651_v24 = vpack.i.bf16 %v3492_v6, %v3483_v55 }
 0x30d   :  { %v1438_v45 = vpop.f32.mrf.mxu0 }
 0x30e   :  { %v1439_v59 = vadd.f32 %v1438_v45, %v1376_v12 }
 0x310   :  { %v1526_v44 = vmul.f32 %v3453_v32, %v1439_v59 }
 0x312   :  { %v1542_v37 = vadd.f32 %v3465_v43, %v1526_v44 }
 0x313   :  { %v1478_v42 = vpop.f32.mrf.mxu2 }
 0x314   :  { %v1479_v56 = vadd.f32 %v1478_v42, %v1376_v12  ;;  %v1552_v26 = vmax.f32 %v1542_v37, 0.0 }
 0x315   :  { %v1458_v7 = vpop.f32.mrf.mxu1 }
 0x316   :  { %v1459_v27 = vadd.f32 %v1458_v7, %v1376_v12  ;;  %v3498_v35 = vmul.f32 %v1552_v26, %v2919_v53  ;;  %v1530_v41 = vmul.f32 %v3453_v32, %v1479_v56 }
 0x318   :  { %1572 = vst [vmem:[#allocation2 + $0x10] sm:$0xff] %v3498_v35  ;;  %v2591_v46 = vpack.i.bf16 %v1563_v13, %v3498_v35  ;;  %v1529_v49 = vmul.f32 %v3453_v32, %v1459_v27  ;;  %v1546_v54 = vadd.f32 %v3465_v43, %v1530_v41 }
 0x31a   :  { %2592 = vrot.lane.b32.xlu2 %v2591_v46, %s2777_s19  ;;  %2597 = vrot.lane.b32.xlu1 %v2591_v46, %s2778_s0  ;;  %v1545_v1 = vadd.f32 %v3465_v43, %v1529_v49  ;;  %v1556_v3 = vmax.f32 %v1546_v54, 0.0 }
 0x31c   :  { %v1498_v9 = vpop.f32.mrf.mxu3  ;;  %v1555_v53 = vmax.f32 %v1545_v1, 0.0  ;;  %v3509_v50 = vmul.f32 %v1556_v3, %v2963_v17 }
 0x31d   :  { %v1499_v61 = vadd.f32 %v1498_v9, %v1376_v12 }
 0x31e   :  { %v3512_v48 = vmul.f32 %v1555_v53, %v2960_v16  ;;  %1576 = vst [vmem:[#allocation2 + $0x20] sm:$0xff] %v3509_v50 }
 0x31f   :  { %v1531_v63 = vmul.f32 %v3453_v32, %v1499_v61 }
 0x320   :  { %1575 = vst [vmem:[#allocation2 + $0x8] sm:$0xff] %v3512_v48  ;;  %v2641_v30 = vpack.i.bf16 %v3512_v48, %v1564_v8  ;;  %v2686_v52 = vpack.i.bf16 %v3509_v50, %v3512_v48 }
 0x321   :  { %v1547_v22 = vadd.f32 %v3465_v43, %v1531_v63 }
 0x322   :  { %2602 = vrot.lane.b32.xlu1 %v2591_v46, %s2779_s20  ;;  %2612 = vrot.lane.b32.xlu2 %v2586_v19, %s2781_s1 }
 0x323   :  { %2642 = vrot.lane.b32.xlu0 %v2641_v30, %s2784_s24  ;;  %v1557_v17 = vmax.f32 %v1547_v22, 0.0 }
 0x325   :  { %v3523_v16 = vmul.f32 %v1557_v17, %v2965_v18  ;;  %v2676_v18 = vpack.i.bf16 %v3498_v35, %v3492_v6 }
 0x327   :  { %1577 = vst [vmem:[#allocation2 + $0x40] sm:$0xff] %v3523_v16  ;;  %v2706_v14 = vpack.i.bf16 %v3477_v58, %v3523_v16  ;;  %v2726_v60 = vpack.i.bf16 %v3523_v16, %v3509_v50 }
 0x32a   :  { %2607 = vrot.lane.b32.xlu1 %v2591_v46, %s2780_s21  ;;  %2617 = vrot.lane.b32.xlu2 %v2586_v19, %s2782_s3 }
 0x32b   :  { %2652 = vrot.lane.b32.xlu0 %v2651_v24, %s2778_s0 }
 0x332   :  { %2627 = vrot.lane.b32.xlu1 %v2641_v30, %s2781_s1  ;;  %2632 = vrot.lane.b32.xlu2 %v2641_v30, %s2782_s3 }
 0x333   :  { %2657 = vrot.lane.b32.xlu0 %v2651_v24, %s2779_s20 }
 0x33a   :  { %2647 = vrot.lane.b32.xlu1 %v2651_v24, %s2777_s19  ;;  %2637 = vrot.lane.b32.xlu2 %v2641_v30, %s2783_s23 }
 0x33b   :  { %2662 = vrot.lane.b32.xlu0 %v2651_v24, %s2780_s21 }
 0x342   :  { %2677 = vrot.lane.b32.xlu1 %v2676_v18, %s2783_s23  ;;  %2687 = vrot.lane.b32.xlu2 %v2686_v52, %s2777_s19 }
 0x343   :  { %2667 = vrot.lane.b32.xlu0 %v2676_v18, %s2781_s1 }
 0x34a   :  { %2682 = vrot.lane.b32.xlu1 %v2676_v18, %s2784_s24  ;;  %2692 = vrot.lane.b32.xlu2 %v2686_v52, %s2778_s0 }
 0x34b   :  { %2672 = vrot.lane.b32.xlu0 %v2676_v18, %s2782_s3 }
 0x352   :  { %2707 = vrot.lane.b32.xlu1 %v2706_v14, %s2777_s19  ;;  %2697 = vrot.lane.b32.xlu2 %v2686_v52, %s2779_s20 }
 0x353   :  { %2702 = vrot.lane.b32.xlu0 %v2686_v52, %s2780_s21 }
 0x356   :  { %v3567_v43 = vpop.permute.xlu0 %2587 }
 0x35a   :  { %2712 = vrot.lane.b32.xlu1 %v2706_v14, %s2778_s0  ;;  %2717 = vrot.lane.b32.xlu2 %v2706_v14, %s2779_s20 }
 0x35b   :  { %2722 = vrot.lane.b32.xlu0 %v2706_v14, %s2780_s21 }
 0x35e   :  { %v3573_v28 = vpop.permute.xlu0 %2622 }
 0x362   :  { %2727 = vrot.lane.b32.xlu1 %v2726_v60, %s2781_s1  ;;  %2732 = vrot.lane.b32.xlu2 %v2726_v60, %s2782_s3 }
 0x363   :  { %2737 = vrot.lane.b32.xlu0 %v2726_v60, %s2783_s23 }
 0x36a   :  { %2742 = vrot.lane.b32.xlu1 %v2726_v60, %s2784_s24  ;;  %2049 = vperm.xlu2 %2425, %v2046_v0  }
 0x374   :  { %v2593_v32 = vpop.permute.xlu2 %2592 }
 0x375   :  { %v2595_v29 = vunpack.i.h.bf16 %v2593_v32  ;;  %v2594_v21 = vunpack.i.l.bf16 %v2593_v32 }
 0x377   :  { %v1778_v25 = vsel %vm426_vm1, %v2594_v21, %v2595_v29 }
 0x378   :  { %2102 = vmatpush.msrb.mxu2 %v1778_v25 }
 0x37c   :  { %v3565_v40 = vpop.permute.xlu2 %2612 }
 0x37d   :  { %v2615_v52 = vunpack.i.h.bf16 %v3565_v40  ;;  %v2614_v14 = vunpack.i.l.bf16 %v3565_v40  ;;  %v2625_v40 = vunpack.i.h.bf16 %v3573_v28 }
 0x384   :  { %v3569_v11 = vpop.permute.xlu2 %2617 }
 0x385   :  { %v2620_v25 = vunpack.i.h.bf16 %v3569_v11 }
 0x38c   :  { %v2598_v47 = vpop.permute.xlu1 %2597  ;;  %v3571_v62 = vpop.permute.xlu2 %2632 }
 0x38d   :  { %v2600_v2 = vunpack.i.h.bf16 %v2598_v47  ;;  %v2599_v57 = vunpack.i.l.bf16 %v2598_v47  ;;  %v2619_v47 = vunpack.i.l.bf16 %v3569_v11  ;;  %v2589_v11 = vunpack.i.l.bf16 %v3567_v43 }
 0x38f   :  { %v1753_v34 = vsel %vm400_vm2, %v2599_v57, %v2600_v2 }
 0x390   :  { %2103 = vmatpush.msrb.mxu2 %v1753_v34  ;;  %v1670_v34 = vsel %vm316_vm5, %v2614_v14, %v2615_v52 }
 0x394   :  { %v2603_v33 = vpop.permute.xlu1 %2602  ;;  %v3576_v20 = vpop.permute.xlu2 %2637 }
 0x395   :  { %v2605_v13 = vunpack.i.h.bf16 %v2603_v33  ;;  %v2604_v8 = vunpack.i.l.bf16 %v2603_v33  ;;  %v3578_v58 = vpop.permute.xlu0 %2642 }
 0x397   :  { %v1728_v12 = vsel %vm374_vm3, %v2604_v8, %v2605_v13  ;;  %v2590_v13 = vunpack.i.h.bf16 %v3567_v43 }
 0x398   :  { %2104 = vmatpush.msrb.mxu2 %v1728_v12 }
 0x39c   :  { %v2608_v15 = vpop.permute.xlu1 %2607  ;;  %v3581_v4 = vpop.permute.xlu2 %2687 }
 0x39d   :  { %v2610_v31 = vunpack.i.h.bf16 %v2608_v15  ;;  %v2609_v23 = vunpack.i.l.bf16 %v2608_v15  ;;  %v2690_v5 = vunpack.i.h.bf16 %v3581_v4  ;;  %v2689_v19 = vunpack.i.l.bf16 %v3581_v4  ;;  %v2653_v36 = vpop.permute.xlu0 %2652 }
 0x39e   :  { %v2655_v42 = vunpack.i.h.bf16 %v2653_v36  ;;  %v2654_v56 = vunpack.i.l.bf16 %v2653_v36  ;;  %v3633_v36 = vld [vmem:[%s3721_s12] sm:$0xff]  ;;  %v2640_v4 = vunpack.i.h.bf16 %v3576_v20 }
 0x39f   :  { %v1703_v10 = vsel %vm348_vm4, %v2609_v23, %v2610_v31  ;;  %v1982_v51 = vsel %vm426_vm1, %v2689_v19, %v2690_v5  ;;  %v1595_v19 = vsel %vm238_vm8, %v2589_v11, %v2590_v13 }
 0x3a0   :  { %2105 = vmatpush.msrb.mxu2 %v1703_v10  ;;  %2122 = vmatpush.msrb.mxu3 %v1982_v51  ;;  %v1751_v30 = vsel %vm400_vm2, %v2654_v56, %v2655_v42  ;;  %v1752_v22 = vsel %vm400_vm2, %v2655_v42, %v2599_v57  ;;  %v2624_v57 = vunpack.i.l.bf16 %v3573_v28 }
 0x3a2   :  { %2106 = vmatpush.msrb.mxu2 %v3498_v35  ;;  %v1620_v12 = vsel %vm264_vm7, %v2624_v57, %v2625_v40 }
 0x3a4   :  { %v3590_v38 = vpop.permute.xlu1 %2627  ;;  %v3592_v39 = vpop.permute.xlu2 %2692 }
 0x3a5   :  { %v2695_v45 = vunpack.i.h.bf16 %v3592_v39  ;;  %v2694_v59 = vunpack.i.l.bf16 %v3592_v39  ;;  %v2658_v44 = vpop.permute.xlu0 %2657 }
 0x3a6   :  { %v2660_v54 = vunpack.i.h.bf16 %v2658_v44  ;;  %v2659_v1 = vunpack.i.l.bf16 %v2658_v44 }
 0x3a7   :  { %v1957_v37 = vsel %vm400_vm2, %v2694_v59, %v2695_v45 }
 0x3a8   :  { %2123 = vmatpush.msrb.mxu3 %v1957_v37  ;;  %v1726_v17 = vsel %vm374_vm3, %v2659_v1, %v2660_v54  ;;  %v1727_v24 = vsel %vm374_vm3, %v2660_v54, %v2604_v8 }
 0x3ac   :  { %v2648_v26 = vpop.permute.xlu1 %2647  ;;  %v3599_v7 = vpop.permute.xlu2 %2697 }
 0x3ad   :  { %v2650_v27 = vunpack.i.h.bf16 %v2648_v26  ;;  %v2649_v35 = vunpack.i.l.bf16 %v2648_v26  ;;  %v2700_v41 = vunpack.i.h.bf16 %v3599_v7  ;;  %v2699_v46 = vunpack.i.l.bf16 %v3599_v7  ;;  %v2663_v49 = vpop.permute.xlu0 %2662 }
 0x3ae   :  { %v2665_v61 = vunpack.i.h.bf16 %v2663_v49  ;;  %v2664_v63 = vunpack.i.l.bf16 %v2663_v49 }
 0x3af   :  { %v1776_v3 = vsel %vm426_vm1, %v2649_v35, %v2650_v27  ;;  %v1777_v9 = vsel %vm426_vm1, %v2650_v27, %v2594_v21  ;;  %v1932_v53 = vsel %vm374_vm3, %v2699_v46, %v2700_v41 }
 0x3b0   :  { %2062 = vmatpush.msrb.mxu0 %v1776_v3  ;;  %2082 = vmatpush.msrb.mxu1 %v1777_v9  ;;  %v1701_v0 = vsel %vm348_vm4, %v2664_v63, %v2665_v61  ;;  %v1702_v32 = vsel %vm348_vm4, %v2665_v61, %v2609_v23  ;;  %v2630_v9 = vunpack.i.h.bf16 %v3590_v38 }
 0x3b1   :  { %2124 = vmatpush.msrb.mxu3 %v1932_v53  ;;  %v2629_v53 = vunpack.i.l.bf16 %v3590_v38 }
 0x3b2   :  { %2063 = vmatpush.msrb.mxu0 %v1751_v30  ;;  %2083 = vmatpush.msrb.mxu1 %v1752_v22  ;;  %v2635_v30 = vunpack.i.h.bf16 %v3571_v62  ;;  %v2634_v22 = vunpack.i.l.bf16 %v3571_v62 }
 0x3b4   :  { %v2678_v18 = vpop.permute.xlu1 %2677  ;;  %2064 = vmatpush.msrb.mxu0 %v1726_v17  ;;  %2084 = vmatpush.msrb.mxu1 %v1727_v24  ;;  %v2718_v61 = vpop.permute.xlu2 %2717  ;;  %v1876_v24 = vsel %vm316_vm5, %v2629_v53, %v2630_v9  ;;  %v1851_v62 = vsel %vm290_vm6, %v2634_v22, %v2635_v30 }
 0x3b5   :  { %v2668_v60 = vpop.permute.xlu0 %2667  ;;  %v2680_v15 = vunpack.i.h.bf16 %v2678_v18  ;;  %v2679_v28 = vunpack.i.l.bf16 %v2678_v18  ;;  %v2720_v38 = vunpack.i.h.bf16 %v2718_v61  ;;  %v2719_v18 = vunpack.i.l.bf16 %v2718_v61 }
 0x3b6   :  { %v2670_v29 = vunpack.i.h.bf16 %v2668_v60  ;;  %v2669_v21 = vunpack.i.l.bf16 %v2668_v60  ;;  %2065 = vmatpush.msrb.mxu0 %v1701_v0  ;;  %2085 = vmatpush.msrb.mxu1 %v1702_v32  ;;  %v2645_v0 = vunpack.i.h.bf16 %v3578_v58  ;;  %v2644_v32 = vunpack.i.l.bf16 %v3578_v58 }
 0x3b7   :  { %v1621_v44 = vsel %vm264_vm7, %v2625_v40, %v2679_v28  ;;  %v1622_v37 = vsel %vm264_vm7, %v2679_v28, %v2680_v15  ;;  %v1933_v58 = vsel %vm374_vm3, %v2700_v41, %v2719_v18 }
 0x3b8   :  { %2066 = vmatpush.msrb.mxu0 %v3483_v55  ;;  %2086 = vmatpush.msrb.mxu1 %v3492_v6  ;;  %v1672_v2 = vsel %vm316_vm5, %v2669_v21, %v2670_v29  ;;  %v1671_v33 = vsel %vm316_vm5, %v2615_v52, %v2669_v21  ;;  %v1645_v55 = vsel %vm290_vm6, %v2619_v47, %v2620_v25 }
 0x3b9   :  { %2107 = vmatpush.msrb.mxu2 %v1672_v2  ;;  %v1934_v47 = vsel %vm374_vm3, %v2719_v18, %v2720_v38  ;;  %v1801_v40 = vsel %vm238_vm8, %v2644_v32, %v2645_v0 }
 0x3ba   :  { %2067 = vmatpush.msrb.mxu0 %v1670_v34  ;;  %2087 = vmatpush.msrb.mxu1 %v1671_v33 }
 0x3bc   :  { %v2683_v6 = vpop.permute.xlu1 %2682  ;;  %2068 = vmatpush.msrb.mxu0 %v1645_v55  ;;  %v2733_v2 = vpop.permute.xlu2 %2732 }
 0x3bd   :  { %v2673_v8 = vpop.permute.xlu0 %2672  ;;  %v2685_v43 = vunpack.i.h.bf16 %v2683_v6  ;;  %v2684_v10 = vunpack.i.l.bf16 %v2683_v6  ;;  %v2734_v7 = vunpack.i.l.bf16 %v2733_v2 }
 0x3be   :  { %v2675_v31 = vunpack.i.h.bf16 %v2673_v8  ;;  %v2674_v23 = vunpack.i.l.bf16 %v2673_v8  ;;  %2069 = vmatpush.msrb.mxu0 %v1620_v12 }
 0x3bf   :  { %v1596_v56 = vsel %vm238_vm8, %v2590_v13, %v2684_v10  ;;  %v1597_v26 = vsel %vm238_vm8, %v2684_v10, %v2685_v43  ;;  %v2735_v13 = vunpack.i.h.bf16 %v2733_v2  ;;  %v1852_v12 = vsel %vm290_vm6, %v2635_v30, %v2734_v7 }
 0x3c0   :  { %2070 = vmatpush.msrb.mxu0 %v1595_v19  ;;  %v1646_v51 = vsel %vm290_vm6, %v2620_v25, %v2674_v23  ;;  %v1647_v59 = vsel %vm290_vm6, %v2674_v23, %v2675_v31 }
 0x3c1   :  { %2088 = vmatpush.msrb.mxu1 %v1646_v51  ;;  %2108 = vmatpush.msrb.mxu2 %v1647_v59  ;;  %v1853_v15 = vsel %vm290_vm6, %v2734_v7, %v2735_v13 }
 0x3c2   :  { %2238 = vmatmul.msk.f32.vlgmr.msrb.gmra.mxu0 %vm703_vm9, %v3633_v36 }
 0x3c3   :  { %2089 = vmatpush.msrb.mxu1 %v1621_v44  ;;  %2109 = vmatpush.msrb.mxu2 %v1622_v37 }
 0x3c4   :  { %v2708_v42 = vpop.permute.xlu1 %2707  ;;  %v2050_v10 = vpop.permute.xlu2 %2049 }
 0x3c5   :  { %v2710_v27 = vunpack.i.h.bf16 %v2708_v42  ;;  %v2709_v35 = vunpack.i.l.bf16 %v2708_v42  ;;  %v2703_v46 = vpop.permute.xlu0 %2702  ;;  %2090 = vmatpush.msrb.mxu1 %v1596_v56  ;;  %2110 = vmatpush.msrb.mxu2 %v1597_v26 }
 0x3c6   :  { %v2705_v49 = vunpack.i.h.bf16 %v2703_v46  ;;  %v2704_v54 = vunpack.i.l.bf16 %v2703_v46  ;;  %2239 = vmatmul.msk.f32.vlgmr.msrb.gmra.mxu1 %vm703_vm9, %v3633_v36  ;;  %2240 = vmatmul.msk.f32.vlgmr.msrb.gmra.mxu2 %vm703_vm9, %v3633_v36 }
 0x3c7   :  { %v1983_v1 = vsel %vm426_vm1, %v2690_v5, %v2709_v35  ;;  %v1984_v3 = vsel %vm426_vm1, %v2709_v35, %v2710_v27  ;;  %v2639_v5 = vunpack.i.l.bf16 %v3576_v20 }
 0x3c8   :  { %v1907_v63 = vsel %vm348_vm4, %v2704_v54, %v2705_v49  ;;  %2142 = vmatpush.msra.mxu0 %v1983_v1  ;;  %2162 = vmatpush.msra.mxu1 %v1984_v3 }
 0x3c9   :  { %2125 = vmatpush.msrb.mxu3 %v1907_v63  ;;  %v1826_v25 = vsel %vm264_vm7, %v2639_v5, %v2640_v4 }
 0x3cb   :  { %2126 = vmatpush.msrb.mxu3 %v3512_v48 }
 0x3cc   :  { %v2713_v17 = vpop.permute.xlu1 %2712 }
 0x3cd   :  { %v2715_v52 = vunpack.i.h.bf16 %v2713_v17  ;;  %v2714_v14 = vunpack.i.l.bf16 %v2713_v17  ;;  %v2723_v60 = vpop.permute.xlu0 %2722  ;;  %2127 = vmatpush.msrb.mxu3 %v1876_v24 }
 0x3ce   :  { %v2724_v48 = vunpack.i.l.bf16 %v2723_v60  ;;  %v2725_v21 = vunpack.i.h.bf16 %v2723_v60 }
 0x3cf   :  { %2128 = vmatpush.msrb.mxu3 %v1851_v62  ;;  %v1958_v20 = vsel %vm400_vm2, %v2695_v45, %v2714_v14  ;;  %v1959_v29 = vsel %vm400_vm2, %v2714_v14, %v2715_v52 }
 0x3d0   :  { %2143 = vmatpush.msra.mxu0 %v1958_v20  ;;  %2163 = vmatpush.msra.mxu1 %v1959_v29  ;;  %v1908_v39 = vsel %vm348_vm4, %v2705_v49, %v2724_v48  ;;  %v1909_v57 = vsel %vm348_vm4, %v2724_v48, %v2725_v21 }
 0x3d1   :  { %2129 = vmatpush.msrb.mxu3 %v1826_v25 }
 0x3d2   :  { %2144 = vmatpush.msra.mxu0 %v1933_v58  ;;  %2164 = vmatpush.msra.mxu1 %v1934_v47 }
 0x3d3   :  { %2130 = vmatpush.msrb.mxu3 %v1801_v40 }
 0x3d4   :  { %2241 = vmatmul.msk.f32.vlgmr.msrb.gmra.mxu3 %vm703_vm9, %v3633_v36  ;;  %v2728_v45 = vpop.permute.xlu1 %2727  ;;  %2145 = vmatpush.msra.mxu0 %v1908_v39 }
 0x3d5   :  { %v2730_v34 = vunpack.i.h.bf16 %v2728_v45  ;;  %v2729_v41 = vunpack.i.l.bf16 %v2728_v45  ;;  %v2738_v33 = vpop.permute.xlu0 %2737  ;;  %2165 = vmatpush.msra.mxu1 %v1909_v57 }
 0x3d6   :  { %2146 = vmatpush.msra.mxu0 %v3509_v50  ;;  %v2739_v11 = vunpack.i.l.bf16 %v2738_v33  ;;  %v2740_v8 = vunpack.i.h.bf16 %v2738_v33 }
 0x3d7   :  { %2166 = vmatpush.msra.mxu1 %v3523_v16  ;;  %v1877_v55 = vsel %vm316_vm5, %v2630_v9, %v2729_v41  ;;  %v1878_v6 = vsel %vm316_vm5, %v2729_v41, %v2730_v34 }
 0x3d8   :  { %2147 = vmatpush.msra.mxu0 %v1877_v55  ;;  %v1827_v28 = vsel %vm264_vm7, %v2640_v4, %v2739_v11  ;;  %v1828_v50 = vsel %vm264_vm7, %v2739_v11, %v2740_v8 }
 0x3d9   :  { %2167 = vmatpush.msra.mxu1 %v1878_v6 }
 0x3da   :  { %2148 = vmatpush.msra.mxu0 %v1852_v12 }
 0x3db   :  { %2168 = vmatpush.msra.mxu1 %v1853_v15 }
 0x3dc   :  { %v2743_v31 = vpop.permute.xlu1 %2742  ;;  %2149 = vmatpush.msra.mxu0 %v1827_v28 }
 0x3dd   :  { %v2745_v16 = vunpack.i.h.bf16 %v2743_v31  ;;  %v2744_v23 = vunpack.i.l.bf16 %v2743_v31  ;;  %2169 = vmatpush.msra.mxu1 %v1828_v50 }
 0x3df   :  { %v1802_v19 = vsel %vm238_vm8, %v2645_v0, %v2744_v23  ;;  %v1803_v43 = vsel %vm238_vm8, %v2744_v23, %v2745_v16 }
 0x3e0   :  { %2150 = vmatpush.msra.mxu0 %v1802_v19  ;;  %2170 = vmatpush.msra.mxu1 %v1803_v43 }
 0x3e1   :  { %2242 = vmatmul.msk.f32.vlgmr.msra.gmra.mxu0 %vm703_vm9, %v3633_v36  ;;  %2243 = vmatmul.msk.f32.vlgmr.msra.gmra.mxu1 %vm703_vm9, %v3633_v36 }
 0x43f   :  { %v2072_v51 = vpop.f32.mrf.mxu0 }
 0x440   :  { %v2073_v59 = vadd.f32 %v2072_v51, %v2050_v10 }
 0x442   :  { %2175 = vst [vmem:[%s3723_s14] sm:$0xff] %v2073_v59 }
 0x443   :  { %v2092_v44 = vpop.f32.mrf.mxu1 }
 0x444   :  { %v2093_v37 = vadd.f32 %v2092_v44, %v2050_v10 }
 0x446   :  { %2176 = vst [vmem:[%s3723_s14 + $0x8] sm:$0xff] %v2093_v37 }
 0x449   :  { %v2112_v42 = vpop.f32.mrf.mxu2 }
 0x44a   :  { %v2113_v56 = vadd.f32 %v2112_v42, %v2050_v10 }
 0x44c   :  { %2177 = vst [vmem:[%s3723_s14 + $0x10] sm:$0xff] %v2113_v56 }
 0x457   :  { %v2132_v36 = vpop.f32.mrf.mxu3 }
 0x458   :  { %v2133_v26 = vadd.f32 %v2132_v36, %v2050_v10 }
 0x45a   :  { %2244 = vst [vmem:[%s3723_s14 + $0x30] sm:$0xff] %v2133_v26 }
 0x45e   :  { %v2152_v27 = vpop.f32.mrf.mxu0  ;;  %v2172_v35 = vpop.f32.mrf.mxu1 }
 0x45f   :  { %v2153_v46 = vadd.f32 %v2152_v27, %v2050_v10  ;;  %v2173_v49 = vadd.f32 %v2172_v35, %v2050_v10 }
 0x461   :  { %2245 = vst [vmem:[%s3723_s14 + $0x38] sm:$0xff] %v2153_v46 }
 0x462   :  { %2246 = vst [vmem:[%s3723_s14 + $0x40] sm:$0xff] %v2173_v49 }
 0x463   :  { %2225 = vsyncpa [#allocation5], 1 }

</bundles_post_ra>
